<compile_context>
chip_gen: v7x
topology: tpu7x:2x2x1
jax: 0.10.0
libtpu: 0.0.40
codegen_flags: <defaults>
</compile_context>

<pallas_src>
import functools

import jax
import jax.numpy as jnp
import numpy as np
from jax.experimental import pallas as pl
from jax.experimental.pallas import tpu as pltpu

EPS = 1e-5  # BatchNorm3d default eps


def _bottleneck_kernel(x_cur_ref, x_nxt_ref,
                       w1_ref, s1_ref, b1_ref,
                       w2_ref, s2_ref, b2_ref,
                       w3_ref, s3_ref, b3_ref,
                       out_ref, ring_ref, *, H, W, P, mm_dtype):
    """One grid step (n, d) computes the output plane out[n, d].

    Grid = (N, D) with D sequential ("arbitrary").  ring_ref is a persistent
    3-slot VMEM ring of conv1+bn1+relu planes in zero-extended flattened
    (row-major, spatially zero-padded) layout; plane dd lives in slot dd % 3.
    Each step computes conv1 only for plane d+1, then conv2 (one im2col MXU
    matmul), conv3, folded BN, residual add and the final ReLU in VMEM.
    """
    d = pl.program_id(1)
    num_d = pl.num_programs(1)
    Hp, Wp = H + 2, W + 2
    HWp = Hp * Wp
    HW = H * W
    EXT = Wp + 1                 # max |spatial tap offset| in flattened coords
    ROWS = HWp + 2 * EXT         # ring-slot rows (zero-extended at both ends)

    x_cur = x_cur_ref[0, 0].astype(jnp.float32)          # (HW, Cin)

    def conv1_ext(x):
        """conv1 + bn1 + relu of one (HW, Cin) plane, returned in the
        flattened, spatially zero-padded, zero-extended (ROWS, P) layout:
        rows [EXT, EXT + HWp) hold the (Hp, Wp) padded plane."""
        t = jnp.dot(x.astype(mm_dtype), w1_ref[...],
                    preferred_element_type=jnp.float32)           # (HW, P)
        t = jnp.maximum(t * s1_ref[...] + b1_ref[...], 0.0)
        t = t.reshape(H, W, P)
        zc = jnp.zeros((H, 1, P), jnp.float32)
        t = jnp.concatenate([zc, t, zc], axis=1)                  # (H, Wp, P)
        zr = jnp.zeros((1, Wp, P), jnp.float32)
        t = jnp.concatenate([zr, t, zr], axis=0)                  # (Hp, Wp, P)
        t = t.reshape(HWp, P)
        ze = jnp.zeros((EXT, P), jnp.float32)
        return jnp.concatenate([ze, t, ze], axis=0)               # (ROWS, P)

    # ---- conv1 rolling ring: conv1 runs exactly once per depth plane -------
    # d == 0 (start of each depth sweep, per n): plane -1 is conv2's zero
    # padding; plane 0 is computed from the residual fetch.
    @pl.when(d == 0)
    def _():
        ring_ref[2] = jnp.zeros((ROWS, P), jnp.float32)           # plane -1
        ring_ref[0] = conv1_ext(x_cur)                            # plane 0

    nxt = (d + 1) % 3

    @pl.when(d + 1 < num_d)
    def _():
        ring_ref[nxt] = conv1_ext(x_nxt_ref[0, 0].astype(jnp.float32))

    @pl.when(d + 1 == num_d)                                      # plane D: zero
    def _():
        ring_ref[nxt] = jnp.zeros((ROWS, P), jnp.float32)

    # ---- conv2: one im2col matmul over the padded plane ---------------------
    # Depth taps folded into channels (3P); the 9 spatial taps are static
    # contiguous row-slices of the zero-extended planes (no strided window
    # slices, no wraparound handling), concatenated into a (HWp, 27P) slab.
    t3 = jnp.concatenate([ring_ref[(d + 2) % 3],                  # plane d-1
                          ring_ref[d % 3],                        # plane d
                          ring_ref[nxt]], axis=1)                 # (ROWS, 3P)
    taps = []
    for kh in range(3):
        for kw in range(3):
            start = EXT + (kh - 1) * Wp + (kw - 1)                # static, >= 0
            taps.append(t3[start:start + HWp, :].astype(mm_dtype))
    slab = jnp.concatenate(taps, axis=1)                          # (HWp, 27P)
    acc = jnp.dot(slab, w2_ref[...], preferred_element_type=jnp.float32)

    # Single interior extraction per step, then bn2 + relu on (HW, P).
    u = acc.reshape(Hp, Wp, P)[1:H + 1, 1:W + 1, :].reshape(HW, P)
    u = jnp.maximum(u * s2_ref[...] + b2_ref[...], 0.0)

    # conv3 + bn3, residual add (downsample=None), final ReLU.
    y = jnp.dot(u.astype(mm_dtype), w3_ref[...],
                preferred_element_type=jnp.float32)               # (HW, Cout)
    y = y * s3_ref[...] + b3_ref[...]
    y = jnp.maximum(y + x_cur, 0.0)
    out_ref[0, 0] = y.astype(out_ref.dtype)


def bottleneck_forward(x, p, *, matmul_dtype=jnp.bfloat16):
    """Pallas implementation of Bottleneck.forward (stride=1, downsample=None).

    x: (N, D, H, W, Cin) with Cin == planes * expansion (required when
    downsample is None).
    """
    N, D, H, W, Cin = x.shape
    P = p["w1"].shape[1]            # planes
    Cout = p["w3"].shape[1]         # planes * expansion
    assert Cout == Cin, "downsample=None requires inplanes == planes * expansion"
    HW = H * W

    def fold(g, b, m, v):
        s = g / jnp.sqrt(v + EPS)
        return (s.reshape(1, -1).astype(jnp.float32),
                (b - m * s).reshape(1, -1).astype(jnp.float32))

    s1, b1 = fold(p["g1"], p["b1"], p["m1"], p["v1"])
    s2, b2 = fold(p["g2"], p["b2"], p["m2"], p["v2"])
    s3, b3 = fold(p["g3"], p["b3"], p["m3"], p["v3"])

    # Weights in matmul dtype (bf16 by default: MXU-native on v6e/v7x, half the
    # VMEM residency).  conv2 weights re-packed to im2col order: rows ordered
    # (kh, kw, kd, cin) to match the kernel's slab column layout.
    w1 = p["w1"].astype(matmul_dtype)
    w2r = jnp.transpose(p["w2"], (1, 2, 0, 3, 4)).reshape(27 * P, P).astype(matmul_dtype)
    w3 = p["w3"].astype(matmul_dtype)

    # Flatten H, W; spatial structure is rebuilt inside the kernel's padded
    # flattened layout (conv2's halo).
    xf = x.reshape(N, D, HW, Cin)

    cur_spec = pl.BlockSpec((1, 1, HW, Cin), lambda n, d: (n, d, 0, 0))
    nxt_spec = pl.BlockSpec((1, 1, HW, Cin),
                            lambda n, d: (n, jnp.minimum(d + 1, D - 1), 0, 0))

    def const_spec(shape):
        zeros = (0,) * len(shape)
        return pl.BlockSpec(shape, lambda n, d: zeros)

    kernel = functools.partial(_bottleneck_kernel, H=H, W=W, P=P,
                               mm_dtype=matmul_dtype)

    rows = (H + 2) * (W + 2) + 2 * (W + 3)   # zero-extended padded plane rows

    out = pl.pallas_call(
        kernel,
        out_shape=jax.ShapeDtypeStruct((N, D, HW, Cout), x.dtype),
        grid=(N, D),
        in_specs=[
            cur_spec, nxt_spec,
            const_spec((Cin, P)), const_spec((1, P)), const_spec((1, P)),
            const_spec((27 * P, P)), const_spec((1, P)), const_spec((1, P)),
            const_spec((P, Cout)), const_spec((1, Cout)), const_spec((1, Cout)),
        ],
        out_specs=pl.BlockSpec((1, 1, HW, Cout), lambda n, d: (n, d, 0, 0)),
        scratch_shapes=[pltpu.VMEM((3, rows, P), jnp.float32)],
        compiler_params=pltpu.CompilerParams(
            # D carries the conv1 ring -> sequential; N shards across v7x cores.
            dimension_semantics=("parallel", "arbitrary"),
            # Modest limit: safe on v7x (64 MiB/TC) as well as v5e/v6e.
            vmem_limit_bytes=32 * 1024 * 1024),
    )(xf, xf,
      w1, s1, b1,
      w2r, s2, b2,
      w3, s3, b3)

    return out.reshape(N, D, H, W, Cout)


def ref_forward(x, p):
    """Pure-JAX (f32) reference for verification."""
    def conv1x1(a, w):
        return jnp.einsum("ndhwc,cf->ndhwf", a, w)

    def conv3x3(a, w):
        return jax.lax.conv_general_dilated(
            a, w, window_strides=(1, 1, 1),
            padding=((1, 1), (1, 1), (1, 1)),
            dimension_numbers=("NDHWC", "DHWIO", "NDHWC"))

    def bn(y, g, b, m, v):
        return (y - m) / jnp.sqrt(v + EPS) * g + b

    out = jax.nn.relu(bn(conv1x1(x, p["w1"]), p["g1"], p["b1"], p["m1"], p["v1"]))
    out = jax.nn.relu(bn(conv3x3(out, p["w2"]), p["g2"], p["b2"], p["m2"], p["v2"]))
    out = bn(conv1x1(out, p["w3"]), p["g3"], p["b3"], p["m3"], p["v3"])
    return jax.nn.relu(out + x)


def make_params(key, inplanes, planes, expansion=4):
    outplanes = planes * expansion
    ks = jax.random.split(key, 15)

    def bn_p(k, c):
        k0, k1, k2, k3 = jax.random.split(k, 4)
        return (jax.random.uniform(k0, (c,), jnp.float32, 0.5, 1.5),   # gamma
                0.1 * jax.random.normal(k1, (c,), jnp.float32),        # beta
                0.1 * jax.random.normal(k2, (c,), jnp.float32),        # running_mean
                jax.random.uniform(k3, (c,), jnp.float32, 0.5, 1.5))   # running_var

    g1, b1, m1, v1 = bn_p(ks[1], planes)
    g2, b2, m2, v2 = bn_p(ks[3], planes)
    g3, b3, m3, v3 = bn_p(ks[5], outplanes)
    return {
        "w1": 0.1 * jax.random.normal(ks[0], (inplanes, planes), jnp.float32),
        "g1": g1, "b1": b1, "m1": m1, "v1": v1,
        "w2": 0.1 * jax.random.normal(ks[2], (3, 3, 3, planes, planes), jnp.float32),
        "g2": g2, "b2": b2, "m2": m2, "v2": v2,
        "w3": 0.1 * jax.random.normal(ks[4], (planes, outplanes), jnp.float32),
        "g3": g3, "b3": b3, "m3": m3, "v3": v3,
    }


if __name__ == "__main__":
    # planes = 4, expansion = 4 -> inplanes = 16 so the downsample=None residual
    # is shape-compatible.  stride = 1.
    # (midplanes = 16*4*27 // (16*9 + 3*4) = 11; unused by Conv3DSimple.)
    planes, expansion = 4, 4
    inplanes = planes * expansion
    N, D, H, W = 2, 4, 8, 8

    key = jax.random.PRNGKey(0)
    kx, kp = jax.random.split(key)
    x = jax.random.normal(kx, (N, D, H, W, inplanes), jnp.float32)  # NDHWC
    params = make_params(kp, inplanes, planes, expansion)

    matmul_dtype = jnp.bfloat16   # MXU operands; accumulation / elementwise stay f32
    out = jax.block_until_ready(bottleneck_forward(x, params, matmul_dtype=matmul_dtype))
    ref = jax.block_until_ready(ref_forward(x, params))

    # bf16 MXU operands (per perf review) loosen the comparison vs. the f32
    # reference; structural errors would show up orders of magnitude larger.
    tol = 5e-2 if matmul_dtype == jnp.bfloat16 else 1e-4
    np.testing.assert_allclose(np.asarray(out), np.asarray(ref), rtol=tol, atol=tol)
    print("KERNEL_OK")
</pallas_src>

<mosaic_0001>
module attributes {stable_mosaic.version = 11 : i64} {
  func.func @_bottleneck_kernel(%arg0: i32, %arg1: i32, %arg2: memref<1x1x64x16xf32, #tpu.memory_space<vmem>>, %arg3: memref<1x1x64x16xf32, #tpu.memory_space<vmem>>, %arg4: memref<16x4xbf16, #tpu.memory_space<vmem>>, %arg5: memref<1x4xf32, #tpu.memory_space<vmem>>, %arg6: memref<1x4xf32, #tpu.memory_space<vmem>>, %arg7: memref<108x4xbf16, #tpu.memory_space<vmem>>, %arg8: memref<1x4xf32, #tpu.memory_space<vmem>>, %arg9: memref<1x4xf32, #tpu.memory_space<vmem>>, %arg10: memref<4x16xbf16, #tpu.memory_space<vmem>>, %arg11: memref<1x16xf32, #tpu.memory_space<vmem>>, %arg12: memref<1x16xf32, #tpu.memory_space<vmem>>, %arg13: memref<1x1x64x16xf32, #tpu.memory_space<vmem>>, %arg14: memref<3x122x4xf32, #tpu.memory_space<vmem>>) attributes {dimension_semantics = [#tpu.dimension_semantics<parallel>, #tpu.dimension_semantics<arbitrary>], iteration_bounds = array<i64: 2, 4>, scalar_prefetch = 0 : i64, scratch_operands = 1 : i64, tpu.core_type = #tpu.core_type<tc>, window_params = [{transform_indices = @transform_0, window_bounds = array<i64: 1, 1, 64, 16>}, {transform_indices = @transform_1, window_bounds = array<i64: 1, 1, 64, 16>}, {pipeline_mode = #tpu.pipeline_mode<synchronous>, transform_indices = @transform_2, window_bounds = array<i64: 16, 4>}, {pipeline_mode = #tpu.pipeline_mode<synchronous>, transform_indices = @transform_3, window_bounds = array<i64: 1, 4>}, {pipeline_mode = #tpu.pipeline_mode<synchronous>, transform_indices = @transform_4, window_bounds = array<i64: 1, 4>}, {pipeline_mode = #tpu.pipeline_mode<synchronous>, transform_indices = @transform_5, window_bounds = array<i64: 108, 4>}, {pipeline_mode = #tpu.pipeline_mode<synchronous>, transform_indices = @transform_6, window_bounds = array<i64: 1, 4>}, {pipeline_mode = #tpu.pipeline_mode<synchronous>, transform_indices = @transform_7, window_bounds = array<i64: 1, 4>}, {pipeline_mode = #tpu.pipeline_mode<synchronous>, transform_indices = @transform_8, window_bounds = array<i64: 4, 16>}, {pipeline_mode = #tpu.pipeline_mode<synchronous>, transform_indices = @transform_9, window_bounds = array<i64: 1, 16>}, {pipeline_mode = #tpu.pipeline_mode<synchronous>, transform_indices = @transform_10, window_bounds = array<i64: 1, 16>}, {transform_indices = @transform_11, window_bounds = array<i64: 1, 1, 64, 16>}]} {
    %c0 = arith.constant 0 : index
    %c0_0 = arith.constant 0 : index
    %c0_1 = arith.constant 0 : index
    %c0_2 = arith.constant 0 : index
    %0 = vector.load %arg2[%c0, %c0_0, %c0_1, %c0_2] : memref<1x1x64x16xf32, #tpu.memory_space<vmem>>, vector<1x1x64x16xf32>
    %1 = vector.shape_cast %0 : vector<1x1x64x16xf32> to vector<64x16xf32>
    %c0_i32 = arith.constant 0 : i32
    %2 = arith.cmpi eq, %arg1, %c0_i32 : i32
    %3 = arith.extui %2 : i1 to i32
    %c0_i32_3 = arith.constant 0 : i32
    %4 = arith.cmpi ne, %3, %c0_i32_3 : i32
    scf.if %4 {
      %cst_51 = arith.constant 0.000000e+00 : f32
      %102 = vector.broadcast %cst_51 : f32 to vector<122x4xf32>
      %c2 = arith.constant 2 : index
      %c0_52 = arith.constant 0 : index
      %c0_53 = arith.constant 0 : index
      %103 = vector.load %arg14[%c2, %c0_52, %c0_53] : memref<3x122x4xf32, #tpu.memory_space<vmem>>, vector<1x122x4xf32>
      %104 = vector.shape_cast %103 : vector<1x122x4xf32> to vector<122x4xf32>
      %105 = vector.shape_cast %102 : vector<122x4xf32> to vector<1x122x4xf32>
      tpu.vector_store %arg14[%c2, %c0_52, %c0_53], %105 {strides = array<i32>} : memref<3x122x4xf32, #tpu.memory_space<vmem>>, vector<1x122x4xf32>,
      %106 = arith.truncf %1 : vector<64x16xf32> to vector<64x16xbf16>
      %c0_54 = arith.constant 0 : index
      %c0_55 = arith.constant 0 : index
      %107 = vector.load %arg4[%c0_54, %c0_55] : memref<16x4xbf16, #tpu.memory_space<vmem>>, vector<16x4xbf16>
      %cst_56 = arith.constant dense<0.000000e+00> : vector<64x4xf32>
      %108 = tpu.matmul %106, %107, %cst_56 {dimension_numbers = #tpu.dot_dimension_numbers<[1], [0], [0], [1], [0, 0, 1, 1], [], []>} : vector<64x16xbf16>, vector<16x4xbf16>, vector<64x4xf32> -> vector<64x4xf32>
      %c0_57 = arith.constant 0 : index
      %c0_58 = arith.constant 0 : index
      %109 = vector.load %arg5[%c0_57, %c0_58] : memref<1x4xf32, #tpu.memory_space<vmem>>, vector<1x4xf32>
      %110 = vector.broadcast %109 : vector<1x4xf32> to vector<64x4xf32>
      %111 = arith.mulf %108, %110 : vector<64x4xf32>
      %c0_59 = arith.constant 0 : index
      %c0_60 = arith.constant 0 : index
      %112 = vector.load %arg6[%c0_59, %c0_60] : memref<1x4xf32, #tpu.memory_space<vmem>>, vector<1x4xf32>
      %113 = vector.broadcast %112 : vector<1x4xf32> to vector<64x4xf32>
      %114 = arith.addf %111, %113 : vector<64x4xf32>
      %cst_61 = arith.constant 0.000000e+00 : f32
      %115 = vector.broadcast %cst_61 : f32 to vector<64x4xf32>
      %116 = arith.maximumf %114, %115 : vector<64x4xf32>
      %117 = vector.shape_cast %116 : vector<64x4xf32> to vector<8x8x4xf32>
      %cst_62 = arith.constant 0.000000e+00 : f32
      %118 = vector.broadcast %cst_62 : f32 to vector<8x1x4xf32>
      %119 = tpu.concatenate %118, %117, %118 in 1 : vector<8x1x4xf32>, vector<8x8x4xf32>, vector<8x1x4xf32> -> vector<8x10x4xf32>
      %cst_63 = arith.constant 0.000000e+00 : f32
      %120 = vector.broadcast %cst_63 : f32 to vector<1x10x4xf32>
      %121 = tpu.concatenate %120, %119, %120 in 0 : vector<1x10x4xf32>, vector<8x10x4xf32>, vector<1x10x4xf32> -> vector<10x10x4xf32>
      %122 = vector.shape_cast %121 : vector<10x10x4xf32> to vector<100x4xf32>
      %cst_64 = arith.constant 0.000000e+00 : f32
      %123 = vector.broadcast %cst_64 : f32 to vector<11x4xf32>
      %124 = tpu.concatenate %123, %122, %123 in 0 : vector<11x4xf32>, vector<100x4xf32>, vector<11x4xf32> -> vector<122x4xf32>
      %c0_65 = arith.constant 0 : index
      %c0_66 = arith.constant 0 : index
      %c0_67 = arith.constant 0 : index
      %125 = vector.load %arg14[%c0_65, %c0_66, %c0_67] : memref<3x122x4xf32, #tpu.memory_space<vmem>>, vector<1x122x4xf32>
      %126 = vector.shape_cast %125 : vector<1x122x4xf32> to vector<122x4xf32>
      %127 = vector.shape_cast %124 : vector<122x4xf32> to vector<1x122x4xf32>
      tpu.vector_store %arg14[%c0_65, %c0_66, %c0_67], %127 {strides = array<i32>} : memref<3x122x4xf32, #tpu.memory_space<vmem>>, vector<1x122x4xf32>,
    } else {
    }
    %c1_i32 = arith.constant 1 : i32
    %5 = arith.addi %arg1, %c1_i32 : i32
    %c3_i32 = arith.constant 3 : i32
    %c0_i32_4 = arith.constant 0 : i32
    %6 = arith.cmpi eq, %c3_i32, %c0_i32_4 : i32
    %c1_i32_5 = arith.constant 1 : i32
    %7 = arith.select %6, %c1_i32_5, %c3_i32 : i32
    %8 = arith.remsi %5, %7 : i32
    %c0_i32_6 = arith.constant 0 : i32
    %9 = arith.cmpi ne, %8, %c0_i32_6 : i32
    %c0_i32_7 = arith.constant 0 : i32
    %10 = arith.cmpi slt, %8, %c0_i32_7 : i32
    %c0_i32_8 = arith.constant 0 : i32
    %11 = arith.cmpi slt, %7, %c0_i32_8 : i32
    %12 = arith.xori %10, %11 : i1
    %13 = arith.andi %12, %9 : i1
    %14 = arith.addi %8, %7 : i32
    %15 = arith.select %13, %14, %8 : i32
    %c1_i32_9 = arith.constant 1 : i32
    %16 = arith.addi %arg1, %c1_i32_9 : i32
    %c4_i32 = arith.constant 4 : i32
    %17 = arith.cmpi slt, %16, %c4_i32 : i32
    %18 = arith.extui %17 : i1 to i32
    %c0_i32_10 = arith.constant 0 : i32
    %19 = arith.cmpi ne, %18, %c0_i32_10 : i32
    scf.if %19 {
      %c0_51 = arith.constant 0 : index
      %c0_52 = arith.constant 0 : index
      %c0_53 = arith.constant 0 : index
      %c0_54 = arith.constant 0 : index
      %102 = vector.load %arg3[%c0_51, %c0_52, %c0_53, %c0_54] : memref<1x1x64x16xf32, #tpu.memory_space<vmem>>, vector<1x1x64x16xf32>
      %103 = vector.shape_cast %102 : vector<1x1x64x16xf32> to vector<64x16xf32>
      %104 = arith.truncf %103 : vector<64x16xf32> to vector<64x16xbf16>
      %c0_55 = arith.constant 0 : index
      %c0_56 = arith.constant 0 : index
      %105 = vector.load %arg4[%c0_55, %c0_56] : memref<16x4xbf16, #tpu.memory_space<vmem>>, vector<16x4xbf16>
      %cst_57 = arith.constant dense<0.000000e+00> : vector<64x4xf32>
      %106 = tpu.matmul %104, %105, %cst_57 {dimension_numbers = #tpu.dot_dimension_numbers<[1], [0], [0], [1], [0, 0, 1, 1], [], []>} : vector<64x16xbf16>, vector<16x4xbf16>, vector<64x4xf32> -> vector<64x4xf32>
      %c0_58 = arith.constant 0 : index
      %c0_59 = arith.constant 0 : index
      %107 = vector.load %arg5[%c0_58, %c0_59] : memref<1x4xf32, #tpu.memory_space<vmem>>, vector<1x4xf32>
      %108 = vector.broadcast %107 : vector<1x4xf32> to vector<64x4xf32>
      %109 = arith.mulf %106, %108 : vector<64x4xf32>
      %c0_60 = arith.constant 0 : index
      %c0_61 = arith.constant 0 : index
      %110 = vector.load %arg6[%c0_60, %c0_61] : memref<1x4xf32, #tpu.memory_space<vmem>>, vector<1x4xf32>
      %111 = vector.broadcast %110 : vector<1x4xf32> to vector<64x4xf32>
      %112 = arith.addf %109, %111 : vector<64x4xf32>
      %cst_62 = arith.constant 0.000000e+00 : f32
      %113 = vector.broadcast %cst_62 : f32 to vector<64x4xf32>
      %114 = arith.maximumf %112, %113 : vector<64x4xf32>
      %115 = vector.shape_cast %114 : vector<64x4xf32> to vector<8x8x4xf32>
      %cst_63 = arith.constant 0.000000e+00 : f32
      %116 = vector.broadcast %cst_63 : f32 to vector<8x1x4xf32>
      %117 = tpu.concatenate %116, %115, %116 in 1 : vector<8x1x4xf32>, vector<8x8x4xf32>, vector<8x1x4xf32> -> vector<8x10x4xf32>
      %cst_64 = arith.constant 0.000000e+00 : f32
      %118 = vector.broadcast %cst_64 : f32 to vector<1x10x4xf32>
      %119 = tpu.concatenate %118, %117, %118 in 0 : vector<1x10x4xf32>, vector<8x10x4xf32>, vector<1x10x4xf32> -> vector<10x10x4xf32>
      %120 = vector.shape_cast %119 : vector<10x10x4xf32> to vector<100x4xf32>
      %cst_65 = arith.constant 0.000000e+00 : f32
      %121 = vector.broadcast %cst_65 : f32 to vector<11x4xf32>
      %122 = tpu.concatenate %121, %120, %121 in 0 : vector<11x4xf32>, vector<100x4xf32>, vector<11x4xf32> -> vector<122x4xf32>
      %123 = arith.index_cast %15 : i32 to index
      %c0_66 = arith.constant 0 : index
      %c0_67 = arith.constant 0 : index
      %124 = vector.load %arg14[%123, %c0_66, %c0_67] : memref<3x122x4xf32, #tpu.memory_space<vmem>>, vector<1x122x4xf32>
      %125 = vector.shape_cast %124 : vector<1x122x4xf32> to vector<122x4xf32>
      %126 = vector.shape_cast %122 : vector<122x4xf32> to vector<1x122x4xf32>
      tpu.vector_store %arg14[%123, %c0_66, %c0_67], %126 {strides = array<i32>} : memref<3x122x4xf32, #tpu.memory_space<vmem>>, vector<1x122x4xf32>,
    } else {
    }
    %c1_i32_11 = arith.constant 1 : i32
    %20 = arith.addi %arg1, %c1_i32_11 : i32
    %c4_i32_12 = arith.constant 4 : i32
    %21 = arith.cmpi eq, %20, %c4_i32_12 : i32
    %22 = arith.extui %21 : i1 to i32
    %c0_i32_13 = arith.constant 0 : i32
    %23 = arith.cmpi ne, %22, %c0_i32_13 : i32
    scf.if %23 {
      %cst_51 = arith.constant 0.000000e+00 : f32
      %102 = vector.broadcast %cst_51 : f32 to vector<122x4xf32>
      %103 = arith.index_cast %15 : i32 to index
      %c0_52 = arith.constant 0 : index
      %c0_53 = arith.constant 0 : index
      %104 = vector.load %arg14[%103, %c0_52, %c0_53] : memref<3x122x4xf32, #tpu.memory_space<vmem>>, vector<1x122x4xf32>
      %105 = vector.shape_cast %104 : vector<1x122x4xf32> to vector<122x4xf32>
      %106 = vector.shape_cast %102 : vector<122x4xf32> to vector<1x122x4xf32>
      tpu.vector_store %arg14[%103, %c0_52, %c0_53], %106 {strides = array<i32>} : memref<3x122x4xf32, #tpu.memory_space<vmem>>, vector<1x122x4xf32>,
    } else {
    }
    %c2_i32 = arith.constant 2 : i32
    %24 = arith.addi %arg1, %c2_i32 : i32
    %c3_i32_14 = arith.constant 3 : i32
    %c0_i32_15 = arith.constant 0 : i32
    %25 = arith.cmpi eq, %c3_i32_14, %c0_i32_15 : i32
    %c1_i32_16 = arith.constant 1 : i32
    %26 = arith.select %25, %c1_i32_16, %c3_i32_14 : i32
    %27 = arith.remsi %24, %26 : i32
    %c0_i32_17 = arith.constant 0 : i32
    %28 = arith.cmpi ne, %27, %c0_i32_17 : i32
    %c0_i32_18 = arith.constant 0 : i32
    %29 = arith.cmpi slt, %27, %c0_i32_18 : i32
    %c0_i32_19 = arith.constant 0 : i32
    %30 = arith.cmpi slt, %26, %c0_i32_19 : i32
    %31 = arith.xori %29, %30 : i1
    %32 = arith.andi %31, %28 : i1
    %33 = arith.addi %27, %26 : i32
    %34 = arith.select %32, %33, %27 : i32
    %35 = arith.index_cast %34 : i32 to index
    %c0_20 = arith.constant 0 : index
    %c0_21 = arith.constant 0 : index
    %36 = vector.load %arg14[%35, %c0_20, %c0_21] : memref<3x122x4xf32, #tpu.memory_space<vmem>>, vector<1x122x4xf32>
    %37 = vector.shape_cast %36 : vector<1x122x4xf32> to vector<122x4xf32>
    %c3_i32_22 = arith.constant 3 : i32
    %c0_i32_23 = arith.constant 0 : i32
    %38 = arith.cmpi eq, %c3_i32_22, %c0_i32_23 : i32
    %c1_i32_24 = arith.constant 1 : i32
    %39 = arith.select %38, %c1_i32_24, %c3_i32_22 : i32
    %40 = arith.remsi %arg1, %39 : i32
    %c0_i32_25 = arith.constant 0 : i32
    %41 = arith.cmpi ne, %40, %c0_i32_25 : i32
    %c0_i32_26 = arith.constant 0 : i32
    %42 = arith.cmpi slt, %40, %c0_i32_26 : i32
    %c0_i32_27 = arith.constant 0 : i32
    %43 = arith.cmpi slt, %39, %c0_i32_27 : i32
    %44 = arith.xori %42, %43 : i1
    %45 = arith.andi %44, %41 : i1
    %46 = arith.addi %40, %39 : i32
    %47 = arith.select %45, %46, %40 : i32
    %48 = arith.index_cast %47 : i32 to index
    %c0_28 = arith.constant 0 : index
    %c0_29 = arith.constant 0 : index
    %49 = vector.load %arg14[%48, %c0_28, %c0_29] : memref<3x122x4xf32, #tpu.memory_space<vmem>>, vector<1x122x4xf32>
    %50 = vector.shape_cast %49 : vector<1x122x4xf32> to vector<122x4xf32>
    %51 = arith.index_cast %15 : i32 to index
    %c0_30 = arith.constant 0 : index
    %c0_31 = arith.constant 0 : index
    %52 = vector.load %arg14[%51, %c0_30, %c0_31] : memref<3x122x4xf32, #tpu.memory_space<vmem>>, vector<1x122x4xf32>
    %53 = vector.shape_cast %52 : vector<1x122x4xf32> to vector<122x4xf32>
    %54 = tpu.concatenate %37, %50, %53 in 1 : vector<122x4xf32>, vector<122x4xf32>, vector<122x4xf32> -> vector<122x12xf32>
    %55 = vector.extract_strided_slice %54 {offsets = [0, 0], sizes = [100, 12], strides = [1, 1]} : vector<122x12xf32> to vector<100x12xf32>
    %56 = arith.truncf %55 : vector<100x12xf32> to vector<100x12xbf16>
    %57 = vector.extract_strided_slice %54 {offsets = [1, 0], sizes = [100, 12], strides = [1, 1]} : vector<122x12xf32> to vector<100x12xf32>
    %58 = arith.truncf %57 : vector<100x12xf32> to vector<100x12xbf16>
    %59 = vector.extract_strided_slice %54 {offsets = [2, 0], sizes = [100, 12], strides = [1, 1]} : vector<122x12xf32> to vector<100x12xf32>
    %60 = arith.truncf %59 : vector<100x12xf32> to vector<100x12xbf16>
    %61 = vector.extract_strided_slice %54 {offsets = [10, 0], sizes = [100, 12], strides = [1, 1]} : vector<122x12xf32> to vector<100x12xf32>
    %62 = arith.truncf %61 : vector<100x12xf32> to vector<100x12xbf16>
    %63 = vector.extract_strided_slice %54 {offsets = [11, 0], sizes = [100, 12], strides = [1, 1]} : vector<122x12xf32> to vector<100x12xf32>
    %64 = arith.truncf %63 : vector<100x12xf32> to vector<100x12xbf16>
    %65 = vector.extract_strided_slice %54 {offsets = [12, 0], sizes = [100, 12], strides = [1, 1]} : vector<122x12xf32> to vector<100x12xf32>
    %66 = arith.truncf %65 : vector<100x12xf32> to vector<100x12xbf16>
    %67 = vector.extract_strided_slice %54 {offsets = [20, 0], sizes = [100, 12], strides = [1, 1]} : vector<122x12xf32> to vector<100x12xf32>
    %68 = arith.truncf %67 : vector<100x12xf32> to vector<100x12xbf16>
    %69 = vector.extract_strided_slice %54 {offsets = [21, 0], sizes = [100, 12], strides = [1, 1]} : vector<122x12xf32> to vector<100x12xf32>
    %70 = arith.truncf %69 : vector<100x12xf32> to vector<100x12xbf16>
    %71 = vector.extract_strided_slice %54 {offsets = [22, 0], sizes = [100, 12], strides = [1, 1]} : vector<122x12xf32> to vector<100x12xf32>
    %72 = arith.truncf %71 : vector<100x12xf32> to vector<100x12xbf16>
    %73 = tpu.concatenate %56, %58, %60, %62, %64, %66, %68, %70, %72 in 1 : vector<100x12xbf16>, vector<100x12xbf16>, vector<100x12xbf16>, vector<100x12xbf16>, vector<100x12xbf16>, vector<100x12xbf16>, vector<100x12xbf16>, vector<100x12xbf16>, vector<100x12xbf16> -> vector<100x108xbf16>
    %c0_32 = arith.constant 0 : index
    %c0_33 = arith.constant 0 : index
    %74 = vector.load %arg7[%c0_32, %c0_33] : memref<108x4xbf16, #tpu.memory_space<vmem>>, vector<108x4xbf16>
    %cst = arith.constant dense<0.000000e+00> : vector<100x4xf32>
    %75 = tpu.matmul %73, %74, %cst {dimension_numbers = #tpu.dot_dimension_numbers<[1], [0], [0], [1], [0, 0, 1, 1], [], []>} : vector<100x108xbf16>, vector<108x4xbf16>, vector<100x4xf32> -> vector<100x4xf32>
    %76 = vector.shape_cast %75 : vector<100x4xf32> to vector<10x10x4xf32>
    %77 = vector.extract_strided_slice %76 {offsets = [1, 1, 0], sizes = [8, 8, 4], strides = [1, 1, 1]} : vector<10x10x4xf32> to vector<8x8x4xf32>
    %78 = vector.shape_cast %77 : vector<8x8x4xf32> to vector<64x4xf32>
    %c0_34 = arith.constant 0 : index
    %c0_35 = arith.constant 0 : index
    %79 = vector.load %arg8[%c0_34, %c0_35] : memref<1x4xf32, #tpu.memory_space<vmem>>, vector<1x4xf32>
    %80 = vector.broadcast %79 : vector<1x4xf32> to vector<64x4xf32>
    %81 = arith.mulf %78, %80 : vector<64x4xf32>
    %c0_36 = arith.constant 0 : index
    %c0_37 = arith.constant 0 : index
    %82 = vector.load %arg9[%c0_36, %c0_37] : memref<1x4xf32, #tpu.memory_space<vmem>>, vector<1x4xf32>
    %83 = vector.broadcast %82 : vector<1x4xf32> to vector<64x4xf32>
    %84 = arith.addf %81, %83 : vector<64x4xf32>
    %cst_38 = arith.constant 0.000000e+00 : f32
    %85 = vector.broadcast %cst_38 : f32 to vector<64x4xf32>
    %86 = arith.maximumf %84, %85 : vector<64x4xf32>
    %87 = arith.truncf %86 : vector<64x4xf32> to vector<64x4xbf16>
    %c0_39 = arith.constant 0 : index
    %c0_40 = arith.constant 0 : index
    %88 = vector.load %arg10[%c0_39, %c0_40] : memref<4x16xbf16, #tpu.memory_space<vmem>>, vector<4x16xbf16>
    %cst_41 = arith.constant dense<0.000000e+00> : vector<64x16xf32>
    %89 = tpu.matmul %87, %88, %cst_41 {dimension_numbers = #tpu.dot_dimension_numbers<[1], [0], [0], [1], [0, 0, 1, 1], [], []>} : vector<64x4xbf16>, vector<4x16xbf16>, vector<64x16xf32> -> vector<64x16xf32>
    %c0_42 = arith.constant 0 : index
    %c0_43 = arith.constant 0 : index
    %90 = vector.load %arg11[%c0_42, %c0_43] : memref<1x16xf32, #tpu.memory_space<vmem>>, vector<1x16xf32>
    %91 = vector.broadcast %90 : vector<1x16xf32> to vector<64x16xf32>
    %92 = arith.mulf %89, %91 : vector<64x16xf32>
    %c0_44 = arith.constant 0 : index
    %c0_45 = arith.constant 0 : index
    %93 = vector.load %arg12[%c0_44, %c0_45] : memref<1x16xf32, #tpu.memory_space<vmem>>, vector<1x16xf32>
    %94 = vector.broadcast %93 : vector<1x16xf32> to vector<64x16xf32>
    %95 = arith.addf %92, %94 : vector<64x16xf32>
    %96 = arith.addf %95, %1 : vector<64x16xf32>
    %cst_46 = arith.constant 0.000000e+00 : f32
    %97 = vector.broadcast %cst_46 : f32 to vector<64x16xf32>
    %98 = arith.maximumf %96, %97 : vector<64x16xf32>
    %c0_47 = arith.constant 0 : index
    %c0_48 = arith.constant 0 : index
    %c0_49 = arith.constant 0 : index
    %c0_50 = arith.constant 0 : index
    %99 = vector.load %arg13[%c0_47, %c0_48, %c0_49, %c0_50] : memref<1x1x64x16xf32, #tpu.memory_space<vmem>>, vector<1x1x64x16xf32>
    %100 = vector.shape_cast %99 : vector<1x1x64x16xf32> to vector<64x16xf32>
    %101 = vector.shape_cast %98 : vector<64x16xf32> to vector<1x1x64x16xf32>
    tpu.vector_store %arg13[%c0_47, %c0_48, %c0_49, %c0_50], %101 {strides = array<i32>} : memref<1x1x64x16xf32, #tpu.memory_space<vmem>>, vector<1x1x64x16xf32>,
    return
  }
  func.func @transform_0(%arg0: i32, %arg1: i32) -> (i32, i32, i32, i32) {
    %c0_i32 = arith.constant 0 : i32
    %c0_i32_0 = arith.constant 0 : i32
    %c0_i32_1 = arith.constant 0 : i32
    return %arg0, %arg1, %c0_i32, %c0_i32_0 : i32, i32, i32, i32
  }
  func.func @transform_1(%arg0: i32, %arg1: i32) -> (i32, i32, i32, i32) {
    %c1_i32 = arith.constant 1 : i32
    %0 = arith.addi %arg1, %c1_i32 : i32
    %c3_i32 = arith.constant 3 : i32
    %1 = arith.minsi %0, %c3_i32 : i32
    %c0_i32 = arith.constant 0 : i32
    %c0_i32_0 = arith.constant 0 : i32
    %c0_i32_1 = arith.constant 0 : i32
    return %arg0, %1, %c0_i32, %c0_i32_0 : i32, i32, i32, i32
  }
  func.func @transform_2(%arg0: i32, %arg1: i32) -> (i32, i32) {
    %c0_i32 = arith.constant 0 : i32
    %c0_i32_0 = arith.constant 0 : i32
    %c0_i32_1 = arith.constant 0 : i32
    return %c0_i32, %c0_i32_0 : i32, i32
  }
  func.func @transform_3(%arg0: i32, %arg1: i32) -> (i32, i32) {
    %c0_i32 = arith.constant 0 : i32
    %c0_i32_0 = arith.constant 0 : i32
    %c0_i32_1 = arith.constant 0 : i32
    return %c0_i32, %c0_i32_0 : i32, i32
  }
  func.func @transform_4(%arg0: i32, %arg1: i32) -> (i32, i32) {
    %c0_i32 = arith.constant 0 : i32
    %c0_i32_0 = arith.constant 0 : i32
    %c0_i32_1 = arith.constant 0 : i32
    return %c0_i32, %c0_i32_0 : i32, i32
  }
  func.func @transform_5(%arg0: i32, %arg1: i32) -> (i32, i32) {
    %c0_i32 = arith.constant 0 : i32
    %c0_i32_0 = arith.constant 0 : i32
    %c0_i32_1 = arith.constant 0 : i32
    return %c0_i32, %c0_i32_0 : i32, i32
  }
  func.func @transform_6(%arg0: i32, %arg1: i32) -> (i32, i32) {
    %c0_i32 = arith.constant 0 : i32
    %c0_i32_0 = arith.constant 0 : i32
    %c0_i32_1 = arith.constant 0 : i32
    return %c0_i32, %c0_i32_0 : i32, i32
  }
  func.func @transform_7(%arg0: i32, %arg1: i32) -> (i32, i32) {
    %c0_i32 = arith.constant 0 : i32
    %c0_i32_0 = arith.constant 0 : i32
    %c0_i32_1 = arith.constant 0 : i32
    return %c0_i32, %c0_i32_0 : i32, i32
  }
  func.func @transform_8(%arg0: i32, %arg1: i32) -> (i32, i32) {
    %c0_i32 = arith.constant 0 : i32
    %c0_i32_0 = arith.constant 0 : i32
    %c0_i32_1 = arith.constant 0 : i32
    return %c0_i32, %c0_i32_0 : i32, i32
  }
  func.func @transform_9(%arg0: i32, %arg1: i32) -> (i32, i32) {
    %c0_i32 = arith.constant 0 : i32
    %c0_i32_0 = arith.constant 0 : i32
    %c0_i32_1 = arith.constant 0 : i32
    return %c0_i32, %c0_i32_0 : i32, i32
  }
  func.func @transform_10(%arg0: i32, %arg1: i32) -> (i32, i32) {
    %c0_i32 = arith.constant 0 : i32
    %c0_i32_0 = arith.constant 0 : i32
    %c0_i32_1 = arith.constant 0 : i32
    return %c0_i32, %c0_i32_0 : i32, i32
  }
  func.func @transform_11(%arg0: i32, %arg1: i32) -> (i32, i32, i32, i32) {
    %c0_i32 = arith.constant 0 : i32
    %c0_i32_0 = arith.constant 0 : i32
    %c0_i32_1 = arith.constant 0 : i32
    return %arg0, %arg1, %c0_i32, %c0_i32_0 : i32, i32, i32, i32
  }
}

</mosaic_0001>

<bundles_post_ra>
// kernel: tpu_custom_call.1
= control target key start
LH: loop header
LB: loop body
LE: loop exit
PB: predicated region body
PF: predicated region fallthrough
CT: control target
= control target key end

     0   :  { %s4184_s17 = smov 0   ;;  %s4186_s18 = smov 0   ;;  %s5650_s0 = inlined_call_operand.vmem [shape: f32[2,4,64,16], index: 0, kind: input, shape index: {}]   ;;  %s5651_s1 = inlined_call_operand.vmem [shape: f32[2,4,64,16], index: 1, kind: input, shape index: {}]   ;;  %s5652_s2 = inlined_call_operand.vmem [shape: bf16[16,4], index: 2, kind: input, shape index: {}]   ;;  %s5653_s3 = inlined_call_operand.vmem [shape: f32[1,4], index: 3, kind: input, shape index: {}]   ;;  %s5654_s4 = inlined_call_operand.vmem [shape: f32[1,4], index: 4, kind: input, shape index: {}]   ;;  %s5655_s5 = inlined_call_operand.vmem [shape: bf16[108,4], index: 5, kind: input, shape index: {}]   ;;  %s5656_s6 = inlined_call_operand.vmem [shape: f32[1,4], index: 6, kind: input, shape index: {}]   ;;  %s5657_s7 = inlined_call_operand.vmem [shape: f32[1,4], index: 7, kind: input, shape index: {}]   ;;  %s5658_s8 = inlined_call_operand.vmem [shape: bf16[4,16], index: 8, kind: input, shape index: {}]   ;;  %s5659_s9 = inlined_call_operand.vmem [shape: f32[1,16], index: 9, kind: input, shape index: {}]   ;;  %s5660_s10 = inlined_call_operand.vmem [shape: f32[1,16], index: 10, kind: input, shape index: {}]   ;;  %s5661_s11 = inlined_call_operand.vmem [shape: f32[2,4,64,16], index: 11, kind: output, shape index: {}]  }
   0x1   :  { %s4188_s19 = smov 0   ;;  %s4190_s20 = smov 0  }
   0x2   :  { %s4192_s21 = smov 0  }
   0x3 LB: > { %s30_s22 = sadd.s32 1, %s4096_s19  ;;  %s33_s23 = sadd.s32 1, %s4100_s20  ;;  %s4104_s21 = sphi %s4192_s21, %s21_s21   ;;  %s4100_s20 = sphi %s4190_s20, %s5669_s20   ;;  %s4096_s19 = sphi %s4188_s19, %s5668_s19   ;;  %s4092_s18 = sphi %s4186_s18, %s5667_s18   ;;  %s4088_s17 = sphi %s4184_s17, %s5666_s17  }
   0x4   : > { %p31_p0 = scmp.ge.s32.totalorder %s30_s22, 4  ;;  %p3716_p1 = scmp.ge.s32.totalorder %s4104_s21, 1 }
   0x5   : > { %p385_p2 = scmp.lt.s32.totalorder %s4104_s21, 9 }
   0x6   : > { %s5671_s22 = smov (%p31_p0, %s30_s22), 0  ;;  %s5673_s23 = smov (!%p31_p0, %s33_s23), %s4100_s20 }
   0x7   : > { %p386_p3 = pnand %p3716_p1, %p385_p2  ;;  %p35_p4 = scmp.ge.s32.totalorder %s5673_s23, 2 }
   0x8   : > { %p445_p5 = scmp.lt.s32.totalorder (!%p386_p3), %s4092_s18, 1  ;;  %p447_p6 = scmp.lt.s32.totalorder (!%p386_p3), %s4088_s17, 3 }
   0x9   : > { %s5675_s23 = smov (%p35_p4, %s5673_s23), 0  ;;  %389 = sbr.rel (%p386_p3) target bundleno = 1419 (0x58b), region = 64 }
   0xa   : > { %5662 = sst [smem:[#allocation3_spill]] %s5675_s23  ;;  %s4218_s24 = sadd.s32 (!%p386_p3), 1, %s4088_s17 }
   0xb   : > { %p455_p7 = scmp.lt.s32.totalorder (!%p386_p3), %s4218_s24, 3  ;;  %p3729_p8 = scmp.ne.s32.totalorder (!%p386_p3), %s4088_s17, 0 }
  0x10   : > { %s5677_s18 = smov (!%p445_p5, %s4092_s18), 1  ;;  %v3971_v8 = vld [vmem:[%s5652_s2] sm:$0xff] (!%p3729_p8)   ;;  %vm522_vm0 = vcmask (!%p3729_p8), 130048   ;;  %v4106_v13 = vmov (!%p3729_p8), 1983009808   ;;  %v700_v15 = vlaneseq (!%p3729_p8)  ;;  %v4107_v19 = vmov (!%p3729_p8), 0.0  }
  0x11   : > { %s448_s25 = scalar_select %p447_p6, %s4088_s17, 3 }
  0x12   : > { %s3718_s26 = sshll.u32 %s5677_s18, 5  ;;  %3821 = vmatprep.subr.bf16.mxu0 (!%p3729_p8), %v3971_v8  ;;  %3893 = vmatprep.subr.bf16.mxu1 (!%p3729_p8), %v3971_v8  ;;  %v698_v14 = vunpack.c.l.s4 (!%p3729_p8), %v4106_v13  ;;  %v701_v17 = vshrl.u32 (!%p3729_p8), %v700_v15, 7  ;;  %v696_v20 = vcombine.high (!%p3729_p8), %v4107_v19, %v4107_v19  ;;  %vm492_vm1 = vcmask (!%p3729_p8), 31744   ;;  %v3735_v33 = vld [vmem:[%s5653_s3] ss:$0 sm:$0xff] (!%p3729_p8) }
  0x13   : > { %s3717_s27 = sshll.u32 %s448_s25, 3  ;;  %3822 = vmatpush3.bf16.msra.mxu0 (!%p3729_p8), %v3971_v8  ;;  %3894 = vmatpush3.bf16.msra.mxu1 (!%p3729_p8), %v3971_v8  ;;  %vm508_vm2 = vcmask (!%p3729_p8), 25600   ;;  %493 = vst.msk [vmem:[#allocation2 + $0x100] sm:$0xff] (!%p3729_p8), %vm492_vm1, %v4107_v19  ;;  %494 = vst.msk [vmem:[#allocation2 + $0x108] sm:$0xff] (!%p3729_p8), %vm492_vm1, %v4107_v19  ;;  %vm1117_vm3 = vcmask (!%p3729_p8), 1042432   ;;  %vm662_vm4 = vcmask (!%p3729_p8), 1040384  }
  0x14   : > { %s451_s28 = sadd.s32 %s3718_s26, %s3717_s27  ;;  %v699_v16 = vunpack.c.0.s8 (!%p3729_p8), %v698_v14  ;;  %495 = vst.msk [vmem:[#allocation2 + $0x110] sm:$0xff] (!%p3729_p8), %vm492_vm1, %v4107_v19  ;;  %496 = vst.msk [vmem:[#allocation2 + $0x118] sm:$0xff] (!%p3729_p8), %vm492_vm1, %v4107_v19  ;;  %v3736_v36 = vld [vmem:[%s5654_s4] ss:$0 sm:$0xff] (!%p3729_p8)  ;;  %vm1157_vm5 = vcmask (!%p3729_p8), 1046528  }
  0x15   : > { %s3719_s29 = sshll.u32 %s451_s28, 3  ;;  %497 = vst.msk [vmem:[#allocation2 + $0x120] sm:$0xff] (!%p3729_p8), %vm492_vm1, %v4107_v19  ;;  %498 = vst.msk [vmem:[#allocation2 + $0x128] sm:$0xff] (!%p3729_p8), %vm492_vm1, %v4107_v19 }
  0x16   : > { %s453_s13 = scalar_lea.vmem %s5650_s0, %s3719_s29  ;;  %s4228_s16 = scalar_lea.vmem %s5661_s11, %s3719_s29  ;;  %v4264_v18 = vsub.s32 (!%p3729_p8), %v699_v16, %v701_v17  ;;  %499 = vst.msk [vmem:[#allocation2 + $0x130] sm:$0xff] (!%p3729_p8), %vm492_vm1, %v4107_v19  ;;  %500 = vst.msk [vmem:[#allocation2 + $0x138] sm:$0xff] (!%p3729_p8), %vm492_vm1, %v4107_v19 }
  0x17   : > { %s456_s23 = scalar_select %p455_p7, %s4218_s24, 3  ;;  %v4231_v0 = vld [vmem:[%s453_s13] sm:$0xff]  ;;  %v4233_v1 = vld [vmem:[%s453_s13 + $0x8] sm:$0xff]  ;;  %v4235_v2 = vld [vmem:[%s453_s13 + $0x10] sm:$0xff] }
  0x18   : > { %v4237_v3 = vld [vmem:[%s453_s13 + $0x18] sm:$0xff]  ;;  %v4239_v4 = vld [vmem:[%s453_s13 + $0x20] sm:$0xff]  ;;  %v4241_v5 = vld [vmem:[%s453_s13 + $0x28] sm:$0xff]  ;;  %490 = sbr.rel (%p3729_p8) target bundleno = 292 (0x124), region = 68  ;;  %v510_v9 = vpack.c.bf16 (!%p3729_p8), %v4233_v1, %v4231_v0  ;;  %v4267_v21 = vrot.slane (!%p3729_p8), %v4107_v19, %v4264_v18  ;;  %v4270_v22 = vrot.slane (!%p3729_p8), %v696_v20, %v4264_v18  ;;  %501 = vst.msk [vmem:[#allocation2 + $0x140] sm:$0xff] (!%p3729_p8), %vm492_vm1, %v4107_v19 }
  0x19   : > { %s5679_s23 = smov (!%p455_p7, %s456_s23), 3  ;;  %v4243_v6 = vld [vmem:[%s453_s13 + $0x30] sm:$0xff]  ;;  %v4245_v7 = vld [vmem:[%s453_s13 + $0x38] sm:$0xff]  ;;  %v512_v10 = vpack.c.bf16 (!%p3729_p8), %v4241_v5, %v4239_v4  ;;  %v511_v11 = vpack.c.bf16 (!%p3729_p8), %v4237_v3, %v4235_v2  ;;  %502 = vst.msk [vmem:[#allocation2 + $0x148] sm:$0xff] (!%p3729_p8), %vm492_vm1, %v4107_v19  ;;  %503 = vst.msk [vmem:[#allocation2 + $0x150] sm:$0xff] (!%p3729_p8), %vm492_vm1, %v4107_v19 }
  0x1a   : > { %s3723_s18 = sshll.u32 %s5679_s23, 3  ;;  %v513_v12 = vpack.c.bf16 (!%p3729_p8), %v4245_v7, %v4243_v6  ;;  %3823 = vmatprep.mubr.msk.bf16.mxu0 (!%p3729_p8), %vm522_vm0, %v510_v9  ;;  %v4274_v23 = vcombine.high (!%p3729_p8), %v4267_v21, %v4267_v21  ;;  %v712_v24 = vcombine.high (!%p3729_p8), %v4270_v22, %v4270_v22  ;;  %504 = vst.msk [vmem:[#allocation2 + $0x158] sm:$0xff] (!%p3729_p8), %vm492_vm1, %v4107_v19  ;;  %505 = vst.msk [vmem:[#allocation2 + $0x160] sm:$0xff] (!%p3729_p8), %vm492_vm1, %v4107_v19 }
  0x1b   : > { %s463_s25 = sadd.s32 %s3723_s18, %s3718_s26  ;;  %3827 = vmatprep.mubr.msk.bf16.mxu1 (!%p3729_p8), %vm522_vm0, %v512_v10  ;;  %3824 = vmatmul.mubr.msk.bf16.vlgmr.msra.gmra.mrb[0].mxu0 (!%p3729_p8), %vm522_vm0, %v511_v11  ;;  %506 = vst.msk [vmem:[#allocation2 + $0x168] sm:$0xff] (!%p3729_p8), %vm492_vm1, %v4107_v19  ;;  %507 = vst.msk [vmem:[#allocation2 + $0x170] sm:$0xff] (!%p3729_p8), %vm492_vm1, %v4107_v19 }
  0x1c   : > { %s3725_s27 = sshll.u32 %s463_s25, 3  ;;  %3828 = vmatmul.mubr.msk.bf16.vlgmr.msra.gmra.mrb[0].mxu1 (!%p3729_p8), %vm522_vm0, %v513_v12  ;;  %v905_v25 = vcombine.low (!%p3729_p8), %v4267_v21, %v4274_v23  ;;  %v906_v26 = vcombine.low (!%p3729_p8), %v4270_v22, %v712_v24  ;;  %509 = vst.msk [vmem:[#allocation2 + $0x178] sm:$0x3] (!%p3729_p8), %vm508_vm2, %v4107_v19  ;;  %1174 = vst.msk [vmem:[#allocation2 + $0x78] sm:$0x3] (!%p3729_p8), %vm508_vm2, %v4107_v19  ;;  %v1093_v32 = vcombine.low (!%p3729_p8), %v4274_v23, %v4270_v22 }
  0x1d   : > { %s4250_s30 = scalar_lea.vmem %s5651_s1, %s3725_s27  ;;  %1159 = vst.msk [vmem:[#allocation2] sm:$0xff] (!%p3729_p8), %vm492_vm1, %v4107_v19  ;;  %1173 = vst.msk [vmem:[#allocation2 + $0x70] sm:$0xff] (!%p3729_p8), %vm492_vm1, %v4107_v19  ;;  %v1109_v34 = vcombine.low (!%p3729_p8), %v712_v24, %v4267_v21 }
  0x1e   : > { %v913_v27 = vrot.slane (!%p3729_p8), %v905_v25, %v4264_v18  ;;  %v920_v28 = vrot.slane (!%p3729_p8), %v906_v26, %v4264_v18  ;;  %v4322_v63 = vrot.slane (!%p3729_p8), %v1093_v32, %v4264_v18 }
  0x1f   : > { %v4317_v46 = vrot.slane %v1109_v34, %v4264_v18 }
  0x20   : > { %v921_v29 = vcombine.low %v913_v27, %v920_v28 }
  0x21   : > { %v1141_v11 = vrot.slane %v4317_v46, 5 }
  0x22   : > { %v4299_v30 = vrot.slane %v921_v29, 5 }
  0x24   : > { %v1156_v31 = vsel %vm1117_vm3, 0.0, %v4299_v30 }
  0x25   : > { %1160 = vst.msk [vmem:[#allocation2 + $0x8] sm:$0xff] %vm492_vm1, %v1156_v31 }
  0xee   : > { %v3825_v35 = vpop.f32.mrb[0].mxu0 }
  0xef   : > { %v3829_v37 = vpop.f32.mrb[0].mxu1  ;;  %v609_v38 = vmul.f32 %v3825_v35, %v3735_v33  ;;  %v569_v40 = vpop.f32.mrb[1].mxu0 }
  0xf0   : > { %v613_v39 = vmul.f32 %v3829_v37, %v3735_v33  ;;  %v585_v41 = vpop.f32.mrb[1].mxu1  ;;  %v607_v42 = vmul.f32 %v3735_v33, %v569_v40  ;;  %v3826_v44 = vpop.f32.mrb[2].mxu0 }
  0xf1   : > { %v611_v43 = vmul.f32 %v3735_v33, %v585_v41  ;;  %v3830_v45 = vpop.f32.mrb[2].mxu1  ;;  %v624_v47 = vadd.f32 %v3736_v36, %v609_v38  ;;  %v610_v49 = vmul.f32 %v3826_v44, %v3735_v33  ;;  %v572_v51 = vpop.f32.mrb[3].mxu0 }
  0xf2   : > { %v628_v48 = vadd.f32 %v3736_v36, %v613_v39  ;;  %v614_v50 = vmul.f32 %v3830_v45, %v3735_v33  ;;  %v588_v52 = vpop.f32.mrb[3].mxu1  ;;  %v622_v53 = vadd.f32 %v3736_v36, %v607_v42  ;;  %v608_v55 = vmul.f32 %v3735_v33, %v572_v51 }
  0xf3   : > { %v626_v54 = vadd.f32 %v3736_v36, %v611_v43  ;;  %v612_v56 = vmul.f32 %v3735_v33, %v588_v52  ;;  %v632_v57 = vmax.f32 %v624_v47, 0.0  ;;  %v625_v59 = vadd.f32 %v3736_v36, %v610_v49 }
  0xf4   : > { %v636_v58 = vmax.f32 %v628_v48, 0.0  ;;  %v4319_v60 = vadd.f32 %v3736_v36, %v614_v50  ;;  %v630_v61 = vmax.f32 %v622_v53, 0.0  ;;  %v4324_v8 = vadd.f32 %v3736_v36, %v608_v55 }
  0xf5   : > { %v634_v62 = vmax.f32 %v626_v54, 0.0  ;;  %v648_v9 = vrot.slane %v632_v57, 7  ;;  %v4327_v12 = vadd.f32 %v3736_v36, %v612_v56  ;;  %v633_v15 = vmax.f32 %v625_v59, 0.0 }
  0xf6   : > { %v652_v10 = vrot.slane %v636_v58, 7  ;;  %v646_v13 = vrot.slane %v630_v61, 7  ;;  %v637_v16 = vmax.f32 %v4319_v60, 0.0  ;;  %v631_v22 = vmax.f32 %v4324_v8, 0.0 }
  0xf7   : > { %v650_v14 = vrot.slane %v634_v62, 7  ;;  %v665_v17 = vsel %vm662_vm4, 0.0, %v648_v9  ;;  %v673_v19 = vsel %vm662_vm4, %v648_v9, 0.0 }
  0xf8   : > { %v669_v20 = vsel %vm662_vm4, 0.0, %v652_v10  ;;  %v761_v23 = vcombine.high %v665_v17, %v665_v17  ;;  %v4335_v24 = vrot.slane %v665_v17, %v4264_v18  ;;  %v677_v25 = vsel %vm662_vm4, %v652_v10, 0.0 }
  0xf9   : > { %v857_v26 = vcombine.high %v669_v20, %v669_v20  ;;  %v784_v27 = vrot.slane %v673_v19, %v4264_v18  ;;  %v4340_v28 = vrot.slane %v669_v20, %v4264_v18  ;;  %v663_v29 = vsel %vm662_vm4, 0.0, %v646_v13 }
  0xfa   : > { %v671_v31 = vsel %vm662_vm4, %v646_v13, 0.0  ;;  %v775_v32 = vrot.slane %v761_v23, %v4264_v18  ;;  %v776_v33 = vcombine.high %v4335_v24, %v4335_v24  ;;  %v713_v35 = vcombine.high %v663_v29, %v663_v29 }
  0xfb   : > { %v871_v34 = vrot.slane %v857_v26, %v4264_v18  ;;  %v872_v36 = vcombine.high %v4340_v28, %v4340_v28  ;;  %v880_v37 = vrot.slane %v677_v25, %v4264_v18  ;;  %v720_v38 = vrot.slane %v663_v29, %v4264_v18 }
  0xfc   : > { %v667_v39 = vsel %vm662_vm4, 0.0, %v650_v14  ;;  %v777_v40 = vcombine.high %v775_v32, %v775_v32  ;;  %v973_v41 = vcombine.low %v776_v33, %v775_v32  ;;  %v727_v43 = vrot.slane %v713_v35, %v4264_v18 }
  0xfd   : > { %v873_v42 = vcombine.high %v871_v34, %v871_v34  ;;  %v1058_v44 = vcombine.low %v872_v36, %v871_v34  ;;  %v728_v45 = vcombine.high %v720_v38, %v720_v38  ;;  %v736_v47 = vrot.slane %v671_v31, %v4264_v18 }
  0xfe   : > { %v922_v48 = vcombine.low %v4267_v21, %v720_v38  ;;  %v974_v49 = vcombine.low %v777_v40, %v784_v27  ;;  %v729_v51 = vcombine.high %v727_v43, %v727_v43  ;;  %v4357_v52 = vsel %vm662_vm4, %v650_v14, 0.0 }
  0xff   : > { %v1059_v50 = vcombine.low %v873_v42, %v880_v37  ;;  %v981_v53 = vrot.slane %v973_v41, %v4264_v18  ;;  %v1066_v54 = vrot.slane %v1058_v44, %v4264_v18  ;;  %v923_v55 = vcombine.low %v728_v45, %v727_v43 }
 0x100   : > { %v809_v56 = vcombine.high %v667_v39, %v667_v39  ;;  %v988_v57 = vrot.slane %v974_v49, %v4264_v18  ;;  %v4363_v59 = vcombine.low %v729_v51, %v736_v47  ;;  %v816_v61 = vrot.slane %v667_v39, %v4264_v18 }
 0x101   : > { %v1073_v58 = vrot.slane %v1059_v50, %v4264_v18  ;;  %v930_v62 = vrot.slane %v922_v48, %v4264_v18  ;;  %v937_v8 = vrot.slane %v923_v55, %v4264_v18  ;;  %v649_v10 = vrot.slane %v633_v15, 7 }
 0x102   : > { %v4369_v9 = vrot.slane %v809_v56, %v4264_v18  ;;  %v4371_v13 = vcombine.low %v981_v53, %v988_v57  ;;  %v824_v17 = vcombine.high %v816_v61, %v816_v61  ;;  %v635_v19 = vmax.f32 %v4327_v12, 0.0 }
 0x103   : > { %v4373_v14 = vcombine.low %v1066_v54, %v1073_v58  ;;  %v4376_v20 = vcombine.low %v930_v62, %v937_v8  ;;  %v832_v23 = vrot.slane %v4357_v52, %v4264_v18  ;;  %v666_v25 = vsel %vm662_vm4, 0.0, %v649_v10 }
 0x104   : > { %v674_v26 = vsel %vm662_vm4, %v649_v10, 0.0  ;;  %v947_v27 = vrot.slane %v4363_v59, %v4264_v18  ;;  %v825_v15 = vcombine.high %v4369_v9, %v4369_v9  ;;  %v1008_v29 = vcombine.low %v824_v17, %v4369_v9 }
 0x105   : > { %v785_v31 = vcombine.high %v666_v25, %v666_v25  ;;  %v1125_v12 = vrot.slane %v4371_v13, 5  ;;  %v1119_v32 = vrot.slane %v4376_v20, 5  ;;  %v792_v33 = vrot.slane %v666_v25, %v4264_v18 }
 0x106   : > { %v808_v34 = vrot.slane %v674_v26, %v4264_v18  ;;  %v1135_v35 = vrot.slane %v4373_v14, 5  ;;  %v653_v37 = vrot.slane %v637_v16, 7  ;;  %v647_v38 = vrot.slane %v631_v22, 7 }
 0x107   : > { %v799_v36 = vrot.slane %v785_v31, %v4264_v18  ;;  %v1120_v39 = vsel %vm1117_vm3, %v4299_v30, %v1119_v32  ;;  %v1022_v40 = vrot.slane %v1008_v29, %v4264_v18  ;;  %v800_v41 = vcombine.high %v792_v33, %v792_v33 }
 0x108   : > { %v1007_v42 = vcombine.low %v808_v34, %v816_v61  ;;  %1161 = vst.msk [vmem:[#allocation2 + $0x10] sm:$0xff] %vm492_vm1, %v1120_v39  ;;  %v670_v44 = vsel %vm662_vm4, 0.0, %v653_v37  ;;  %v678_v45 = vsel %vm662_vm4, %v653_v37, 0.0  ;;  %v664_v60 = vsel %vm662_vm4, 0.0, %v647_v38 }
 0x109   : > { %v801_v43 = vcombine.high %v799_v36, %v799_v36  ;;  %v990_v16 = vcombine.low %v792_v33, %v800_v41  ;;  %v881_v47 = vcombine.high %v670_v44, %v670_v44  ;;  %v888_v48 = vrot.slane %v670_v44, %v4264_v18 }
 0x10a   : > { %v1015_v22 = vrot.slane %v1007_v42, %v4264_v18  ;;  %v904_v49 = vrot.slane %v678_v45, %v4264_v18  ;;  %v672_v50 = vsel %vm662_vm4, %v647_v38, 0.0  ;;  %v737_v51 = vcombine.high %v664_v60, %v664_v60 }
 0x10b   : > { %v991_v30 = vcombine.low %v799_v36, %v801_v43  ;;  %v998_v53 = vrot.slane %v990_v16, %v4264_v18  ;;  %v895_v55 = vrot.slane %v881_v47, %v4264_v18  ;;  %v896_v56 = vcombine.high %v888_v48, %v888_v48 }
 0x10c   : > { %v4409_v54 = vcombine.low %v1015_v22, %v1022_v40  ;;  %v1092_v58 = vcombine.low %v904_v49, %v4267_v21  ;;  %v744_v61 = vrot.slane %v664_v60, %v4264_v18  ;;  %v751_v62 = vrot.slane %v737_v51, %v4264_v18 }
 0x10d   : > { %v1005_v57 = vrot.slane %v991_v30, %v4264_v18  ;;  %v897_v10 = vcombine.high %v895_v55, %v895_v55  ;;  %v1075_v17 = vcombine.low %v888_v48, %v896_v56  ;;  %v760_v25 = vrot.slane %v672_v50, %v4264_v18 }
 0x10e   : > { %v1129_v8 = vrot.slane %v4409_v54, 5  ;;  %v1100_v29 = vrot.slane %v1092_v58, %v4264_v18  ;;  %v752_v31 = vcombine.high %v744_v61, %v744_v61  ;;  %v753_v33 = vcombine.high %v751_v62, %v751_v62 }
 0x10f   : > { %v1006_v26 = vcombine.low %v998_v53, %v1005_v57  ;;  %v1076_v34 = vcombine.low %v895_v55, %v897_v10  ;;  %v1083_v36 = vrot.slane %v1075_v17, %v4264_v18  ;;  %v957_v21 = vcombine.low %v760_v25, %v4335_v24 }
 0x110   : > { %v651_v37 = vrot.slane %v635_v19, 7  ;;  %v1108_v39 = vcombine.low %v1100_v29, %v4322_v63  ;;  %v940_v40 = vcombine.low %v744_v61, %v752_v31  ;;  %v956_v41 = vcombine.low %v751_v62, %v753_v33 }
 0x111   : > { %v1127_v38 = vrot.slane %v1006_v26, 5  ;;  %v1090_v42 = vrot.slane %v1076_v34, %v4264_v18  ;;  %v971_v43 = vrot.slane %v957_v21, %v4264_v18  ;;  %v1024_v30 = vcombine.low %v825_v15, %v832_v23 }
 0x112   : > { %v668_v44 = vsel %vm662_vm4, 0.0, %v651_v37  ;;  %v676_v45 = vsel %vm662_vm4, %v651_v37, 0.0  ;;  %v1139_v19 = vrot.slane %v1108_v39, 5  ;;  %v954_v63 = vrot.slane %v940_v40, %v4264_v18 }
 0x113   : > { %v1128_v60 = vsel %vm1117_vm3, %v1125_v12, %v1127_v38  ;;  %v1130_v24 = vsel %vm1117_vm3, %v1127_v38, %v1129_v8  ;;  %v1091_v16 = vcombine.low %v1083_v36, %v1090_v42  ;;  %v964_v22 = vrot.slane %v956_v41, %v4264_v18 }
 0x114   : > { %1165 = vst.msk [vmem:[#allocation2 + $0x30] sm:$0xff] %vm492_vm1, %v1128_v60  ;;  %1166 = vst.msk [vmem:[#allocation2 + $0x38] sm:$0xff] %vm492_vm1, %v1130_v24  ;;  %v833_v47 = vcombine.high %v668_v44, %v668_v44  ;;  %v840_v48 = vrot.slane %v668_v44, %v4264_v18  ;;  %v1142_v49 = vsel %vm1117_vm3, %v1139_v19, %v1141_v11 }
 0x115   : > { %v955_v50 = vcombine.low %v947_v27, %v954_v63  ;;  %v856_v51 = vrot.slane %v676_v45, %v4264_v18  ;;  %v1137_v53 = vrot.slane %v1091_v16, 5  ;;  %v1158_v55 = vsel %vm1157_vm5, %v1142_v49, 0.0 }
 0x116   : > { %v972_v56 = vcombine.low %v964_v22, %v971_v43  ;;  %v847_v52 = vrot.slane %v833_v47, %v4264_v18  ;;  %1172 = vst.msk [vmem:[#allocation2 + $0x68] sm:$0xff] %vm492_vm1, %v1158_v55  ;;  %v848_v23 = vcombine.high %v840_v48, %v840_v48  ;;  %v1032_v57 = vrot.slane %v1024_v30, %v4264_v18 }
 0x117   : > { %v1121_v9 = vrot.slane %v955_v50, 5  ;;  %v1042_v46 = vcombine.low %v856_v51, %v4340_v28  ;;  %v1138_v11 = vsel %vm1117_vm3, %v1135_v35, %v1137_v53  ;;  %v1140_v59 = vsel %vm1117_vm3, %v1137_v53, %v1139_v19 }
 0x118   : > { %v1123_v27 = vrot.slane %v972_v56, 5  ;;  %v849_v15 = vcombine.high %v847_v52, %v847_v52  ;;  %1170 = vst.msk [vmem:[#allocation2 + $0x58] sm:$0xff] %vm492_vm1, %v1138_v11  ;;  %1171 = vst.msk [vmem:[#allocation2 + $0x60] sm:$0xff] %vm492_vm1, %v1140_v59  ;;  %v1025_v61 = vcombine.low %v840_v48, %v848_v23 }
 0x119   : > { %v1122_v58 = vsel %vm1117_vm3, %v1119_v32, %v1121_v9  ;;  %v1056_v32 = vrot.slane %v1042_v46, %v4264_v18 }
 0x11a   : > { %v1124_v28 = vsel %vm1117_vm3, %v1121_v9, %v1123_v27  ;;  %v1126_v62 = vsel %vm1117_vm3, %v1123_v27, %v1125_v12  ;;  %1162 = vst.msk [vmem:[#allocation2 + $0x18] sm:$0xff] %vm492_vm1, %v1122_v58  ;;  %v1041_v10 = vcombine.low %v847_v52, %v849_v15  ;;  %v1039_v17 = vrot.slane %v1025_v61, %v4264_v18 }
 0x11b   : > { %1163 = vst.msk [vmem:[#allocation2 + $0x20] sm:$0xff] %vm492_vm1, %v1124_v28  ;;  %1164 = vst.msk [vmem:[#allocation2 + $0x28] sm:$0xff] %vm492_vm1, %v1126_v62 }
 0x11c   : > { %v1049_v20 = vrot.slane %v1041_v10, %v4264_v18  ;;  %v1040_v25 = vcombine.low %v1032_v57, %v1039_v17 }
 0x11e   : > { %v1057_v26 = vcombine.low %v1049_v20, %v1056_v32  ;;  %v1131_v29 = vrot.slane %v1040_v25, 5 }
 0x120   : > { %v1133_v31 = vrot.slane %v1057_v26, 5  ;;  %v1132_v13 = vsel %vm1117_vm3, %v1129_v8, %v1131_v29 }
 0x121   : > { %1167 = vst.msk [vmem:[#allocation2 + $0x40] sm:$0xff] %vm492_vm1, %v1132_v13 }
 0x122   : > { %v1134_v12 = vsel %vm1117_vm3, %v1131_v29, %v1133_v31  ;;  %v1136_v33 = vsel %vm1117_vm3, %v1133_v31, %v1135_v35 }
 0x123   : > { %1168 = vst.msk [vmem:[#allocation2 + $0x48] sm:$0xff] %vm492_vm1, %v1134_v12  ;;  %1169 = vst.msk [vmem:[#allocation2 + $0x50] sm:$0xff] %vm492_vm1, %v1136_v33 }
 0x124 PF: > { %s1177_s18 = ssub.s32 0, %s4218_s24  ;;  %p1176_p9 = scmp.lt.s32.totalorder %s4218_s24, 0 }
 0x125   : > { %s3737_s25 = smin.u32 %s1177_s18, %s4218_s24  ;;  %p3740_p11 = scmp.ge.s32.totalorder %s4218_s24, 4 }
 0x126   : > { %3972 = sdivrem.u32 %s3737_s25, 3  ;;  %v3974_v18 = vld [vmem:[%s5652_s2] sm:$0xff] (!%p3740_p11)   ;;  %v1194_v35 = vld [vmem:[%s4250_s30 + $0x8] sm:$0xff] (!%p3740_p11)  ;;  %vm1213_vm6 = vcmask (!%p3740_p11), 130048   ;;  %v1195_v36 = vld [vmem:[%s4250_s30 + $0x10] sm:$0xff] (!%p3740_p11)  ;;  %v1391_v44 = vlaneseq (!%p3740_p11)  ;;  %v4109_v19 = vmov (!%p3740_p11), 0.0  }
 0x127   : > { %v1193_v14 = vld [vmem:[%s4250_s30] sm:$0xff] (!%p3740_p11)  ;;  %3831 = vmatprep.subr.bf16.mxu0 (!%p3740_p11), %v3974_v18  ;;  %3895 = vmatprep.subr.bf16.mxu1 (!%p3740_p11), %v3974_v18  ;;  %v1198_v34 = vld [vmem:[%s4250_s30 + $0x28] sm:$0xff] (!%p3740_p11)  ;;  %v1196_v21 = vld [vmem:[%s4250_s30 + $0x18] sm:$0xff] (!%p3740_p11)  ;;  %v4108_v42 = vmov (!%p3740_p11), 1983009808   ;;  %v1387_v63 = vcombine.high (!%p3740_p11), %v4109_v19, %v4109_v19  ;;  %vm1808_vm7 = vcmask (!%p3740_p11), 1042432  }
 0x128   : > { %v1197_v54 = vld [vmem:[%s4250_s30 + $0x20] sm:$0xff] (!%p3740_p11)  ;;  %v1201_v8 = vpack.c.bf16 (!%p3740_p11), %v1194_v35, %v1193_v14  ;;  %3832 = vmatpush3.bf16.msra.mxu0 (!%p3740_p11), %v3974_v18  ;;  %3896 = vmatpush3.bf16.msra.mxu1 (!%p3740_p11), %v3974_v18  ;;  %v1202_v38 = vpack.c.bf16 (!%p3740_p11), %v1196_v21, %v1195_v36  ;;  %v1199_v39 = vld [vmem:[%s4250_s30 + $0x30] sm:$0xff] (!%p3740_p11)  ;;  %v1200_v40 = vld [vmem:[%s4250_s30 + $0x38] sm:$0xff] (!%p3740_p11)  ;;  %v1389_v43 = vunpack.c.l.s4 (!%p3740_p11), %v4108_v42  ;;  %v1392_v60 = vshrl.u32 (!%p3740_p11), %v1391_v44, 7 }
 0x129   : > { %v1203_v37 = vpack.c.bf16 (!%p3740_p11), %v1198_v34, %v1197_v54  ;;  %v1204_v41 = vpack.c.bf16 (!%p3740_p11), %v1200_v40, %v1199_v39  ;;  %vm1852_vm8 = vcmask (!%p3740_p11), 31744   ;;  %vm1868_vm9 = vcmask (!%p3740_p11), 25600   ;;  %v3746_v9 = vld [vmem:[%s5653_s3] ss:$0 sm:$0xff] (!%p3740_p11) }
 0x12a   : > { %3833 = vmatprep.mubr.msk.bf16.mxu0 (!%p3740_p11), %vm1213_vm6, %v1201_v8  ;;  %v1390_v45 = vunpack.c.0.s8 (!%p3740_p11), %v1389_v43  ;;  %v3747_v11 = vld [vmem:[%s5654_s4] ss:$0 sm:$0xff] (!%p3740_p11)  ;;  %vm1353_vm10 = vcmask (!%p3740_p11), 1040384   ;;  %vm1848_vm11 = vcmask (!%p3740_p11), 1046528  }
 0x12b   : > { %3837 = vmatprep.mubr.msk.bf16.mxu1 (!%p3740_p11), %vm1213_vm6, %v1203_v37  ;;  %3834 = vmatmul.mubr.msk.bf16.vlgmr.msra.gmra.mrb[0].mxu0 (!%p3740_p11), %vm1213_vm6, %v1202_v38 }
 0x12c   : > { %3838 = vmatmul.mubr.msk.bf16.vlgmr.msra.gmra.mrb[0].mxu1 (!%p3740_p11), %vm1213_vm6, %v1204_v41  ;;  %v4505_v24 = vsub.s32 (!%p3740_p11), %v1390_v45, %v1392_v60 }
 0x12e   : > { %1192 = sbr.rel (%p3740_p11) target bundleno = 564 (0x234), region = 72  ;;  %v4508_v16 = vrot.slane (!%p3740_p11), %v4109_v19, %v4505_v24  ;;  %v1401_v22 = vrot.slane (!%p3740_p11), %v1387_v63, %v4505_v24 }
 0x12f   : > { %s3973_s27 = spop.drf %3972 }
 0x130   : > { %s1181_s28 = ssub.s32 0, %s3973_s27  ;;  %v1402_v47 = vcombine.high (!%p3740_p11), %v4508_v16, %v4508_v16  ;;  %v1403_v48 = vcombine.high (!%p3740_p11), %v1401_v22, %v1401_v22 }
 0x131   : > { %s5681_s28 = smov (!%p1176_p9, %s1181_s28), %s3973_s27 }
 0x132   : > { %p3739_p10 = scmp.lt.s32.totalorder %s5681_s28, 0  ;;  %s1187_s29 = sadd.s32 3, %s5681_s28  ;;  %v1596_v30 = vcombine.low (!%p3740_p11), %v4508_v16, %v1402_v47  ;;  %v1597_v49 = vcombine.low (!%p3740_p11), %v1401_v22, %v1403_v48  ;;  %v1784_v52 = vcombine.low (!%p3740_p11), %v1402_v47, %v1401_v22  ;;  %v1800_v23 = vcombine.low (!%p3740_p11), %v1403_v48, %v4508_v16 }
 0x134   : > { %s5683_s29 = smov (!%p3739_p10, %s1187_s29), %s5681_s28  ;;  %v1604_v50 = vrot.slane (!%p3740_p11), %v1596_v30, %v4505_v24  ;;  %v1611_v51 = vrot.slane (!%p3740_p11), %v1597_v49, %v4505_v24  ;;  %v4538_v17 = vrot.slane (!%p3740_p11), %v1800_v23, %v4505_v24  ;;  %v4543_v21 = vrot.slane (!%p3740_p11), %v1784_v52, %v4505_v24 }
 0x135   : > { %s3748_s30 = sshll.u32 %s5683_s29, 7 }
 0x136   : > { %v1612_v53 = vcombine.low %v1604_v50, %v1611_v51  ;;  %s4521_s23 = scalar_lea.vmem [#allocation2], %s3748_s30  ;;  %v1832_v40 = vrot.slane %v4538_v17, 5 }
 0x137   : > { %1853 = vst.msk [vmem:[%s4521_s23] sm:$0xff] %vm1852_vm8, %v4109_v19  ;;  %1867 = vst.msk [vmem:[%s4521_s23 + $0x70] sm:$0xff] %vm1852_vm8, %v4109_v19 }
 0x138   : > { %v4516_v55 = vrot.slane %v1612_v53, 5  ;;  %1869 = vst.msk [vmem:[%s4521_s23 + $0x78] sm:$0x3] %vm1868_vm9, %v4109_v19 }
 0x13a   : > { %v1847_v56 = vsel %vm1808_vm7, 0.0, %v4516_v55 }
 0x13b   : > { %1854 = vst.msk [vmem:[%s4521_s23 + $0x8] sm:$0xff] %vm1852_vm8, %v1847_v56 }
 0x1fe   : > { %v3835_v46 = vpop.f32.mrb[0].mxu0 }
 0x1ff   : > { %v3839_v59 = vpop.f32.mrb[0].mxu1  ;;  %v1300_v27 = vmul.f32 %v3835_v46, %v3746_v9  ;;  %v1260_v57 = vpop.f32.mrb[1].mxu0 }
 0x200   : > { %v1304_v15 = vmul.f32 %v3839_v59, %v3746_v9  ;;  %v1276_v58 = vpop.f32.mrb[1].mxu1  ;;  %v1298_v61 = vmul.f32 %v3746_v9, %v1260_v57  ;;  %v3836_v62 = vpop.f32.mrb[2].mxu0 }
 0x201   : > { %v1302_v28 = vmul.f32 %v3746_v9, %v1276_v58  ;;  %v3840_v10 = vpop.f32.mrb[2].mxu1  ;;  %v1315_v20 = vadd.f32 %v3747_v11, %v1300_v27  ;;  %v1301_v25 = vmul.f32 %v3836_v62, %v3746_v9  ;;  %v1263_v29 = vpop.f32.mrb[3].mxu0 }
 0x202   : > { %v1319_v32 = vadd.f32 %v3747_v11, %v1304_v15  ;;  %v1305_v26 = vmul.f32 %v3840_v10, %v3746_v9  ;;  %v1279_v31 = vpop.f32.mrb[3].mxu1  ;;  %v1313_v13 = vadd.f32 %v3747_v11, %v1298_v61  ;;  %v1299_v33 = vmul.f32 %v3746_v9, %v1263_v29 }
 0x203   : > { %v1317_v12 = vadd.f32 %v3747_v11, %v1302_v28  ;;  %v1303_v18 = vmul.f32 %v3746_v9, %v1279_v31  ;;  %v1323_v14 = vmax.f32 %v1315_v20, 0.0  ;;  %v1316_v54 = vadd.f32 %v3747_v11, %v1301_v25 }
 0x204   : > { %v1327_v35 = vmax.f32 %v1319_v32, 0.0  ;;  %v4540_v8 = vadd.f32 %v3747_v11, %v1305_v26  ;;  %v1321_v34 = vmax.f32 %v1313_v13, 0.0  ;;  %v4545_v37 = vadd.f32 %v3747_v11, %v1299_v33 }
 0x205   : > { %v1325_v36 = vmax.f32 %v1317_v12, 0.0  ;;  %v1339_v38 = vrot.slane %v1323_v14, 7  ;;  %v4548_v41 = vadd.f32 %v3747_v11, %v1303_v18  ;;  %v1324_v44 = vmax.f32 %v1316_v54, 0.0 }
 0x206   : > { %v1343_v39 = vrot.slane %v1327_v35, 7  ;;  %v1337_v42 = vrot.slane %v1321_v34, 7  ;;  %v1328_v45 = vmax.f32 %v4540_v8, 0.0  ;;  %v1322_v22 = vmax.f32 %v4545_v37, 0.0 }
 0x207   : > { %v1341_v43 = vrot.slane %v1325_v36, 7  ;;  %v1356_v60 = vsel %vm1353_vm10, 0.0, %v1339_v38  ;;  %v1364_v19 = vsel %vm1353_vm10, %v1339_v38, 0.0 }
 0x208   : > { %v1360_v63 = vsel %vm1353_vm10, 0.0, %v1343_v39  ;;  %v1452_v47 = vcombine.high %v1356_v60, %v1356_v60  ;;  %v4556_v48 = vrot.slane %v1356_v60, %v4505_v24  ;;  %v1368_v30 = vsel %vm1353_vm10, %v1343_v39, 0.0 }
 0x209   : > { %v1548_v49 = vcombine.high %v1360_v63, %v1360_v63  ;;  %v1475_v50 = vrot.slane %v1364_v19, %v4505_v24  ;;  %v4561_v51 = vrot.slane %v1360_v63, %v4505_v24  ;;  %v1354_v53 = vsel %vm1353_vm10, 0.0, %v1337_v42 }
 0x20a   : > { %v1362_v56 = vsel %vm1353_vm10, %v1337_v42, 0.0  ;;  %v1466_v52 = vrot.slane %v1452_v47, %v4505_v24  ;;  %v1467_v9 = vcombine.high %v4556_v48, %v4556_v48  ;;  %v1404_v46 = vcombine.high %v1354_v53, %v1354_v53 }
 0x20b   : > { %v1562_v23 = vrot.slane %v1548_v49, %v4505_v24  ;;  %v1563_v11 = vcombine.high %v4561_v51, %v4561_v51  ;;  %v1571_v59 = vrot.slane %v1368_v30, %v4505_v24  ;;  %v1411_v27 = vrot.slane %v1354_v53, %v4505_v24 }
 0x20c   : > { %v1358_v15 = vsel %vm1353_vm10, 0.0, %v1341_v43  ;;  %v1468_v57 = vcombine.high %v1466_v52, %v1466_v52  ;;  %v1664_v58 = vcombine.low %v1467_v9, %v1466_v52  ;;  %v1418_v28 = vrot.slane %v1404_v46, %v4505_v24 }
 0x20d   : > { %v1564_v61 = vcombine.high %v1562_v23, %v1562_v23  ;;  %v1749_v62 = vcombine.low %v1563_v11, %v1562_v23  ;;  %v1419_v10 = vcombine.high %v1411_v27, %v1411_v27  ;;  %v1427_v20 = vrot.slane %v1362_v56, %v4505_v24 }
 0x20e   : > { %v1613_v32 = vcombine.low %v4508_v16, %v1411_v27  ;;  %v1665_v25 = vcombine.low %v1468_v57, %v1475_v50  ;;  %v1420_v29 = vcombine.high %v1418_v28, %v1418_v28  ;;  %v4578_v31 = vsel %vm1353_vm10, %v1341_v43, 0.0 }
 0x20f   : > { %v1750_v26 = vcombine.low %v1564_v61, %v1571_v59  ;;  %v1672_v13 = vrot.slane %v1664_v58, %v4505_v24  ;;  %v1757_v12 = vrot.slane %v1749_v62, %v4505_v24  ;;  %v1614_v33 = vcombine.low %v1419_v10, %v1418_v28 }
 0x210   : > { %v1500_v18 = vcombine.high %v1358_v15, %v1358_v15  ;;  %v1679_v14 = vrot.slane %v1665_v25, %v4505_v24  ;;  %v4584_v54 = vcombine.low %v1420_v29, %v1427_v20  ;;  %v1507_v34 = vrot.slane %v1358_v15, %v4505_v24 }
 0x211   : > { %v1764_v35 = vrot.slane %v1750_v26, %v4505_v24  ;;  %v1621_v36 = vrot.slane %v1613_v32, %v4505_v24  ;;  %v1628_v37 = vrot.slane %v1614_v33, %v4505_v24  ;;  %v1340_v39 = vrot.slane %v1324_v44, 7 }
 0x212   : > { %v4590_v38 = vrot.slane %v1500_v18, %v4505_v24  ;;  %v4592_v42 = vcombine.low %v1672_v13, %v1679_v14  ;;  %v1515_v60 = vcombine.high %v1507_v34, %v1507_v34  ;;  %v1326_v19 = vmax.f32 %v4548_v41, 0.0 }
 0x213   : > { %v4594_v43 = vcombine.low %v1757_v12, %v1764_v35  ;;  %v4597_v63 = vcombine.low %v1621_v36, %v1628_v37  ;;  %v1523_v47 = vrot.slane %v4578_v31, %v4505_v24  ;;  %v1357_v30 = vsel %vm1353_vm10, 0.0, %v1340_v39 }
 0x214   : > { %v1365_v49 = vsel %vm1353_vm10, %v1340_v39, 0.0  ;;  %v1638_v50 = vrot.slane %v4584_v54, %v4505_v24  ;;  %v1516_v44 = vcombine.high %v4590_v38, %v4590_v38  ;;  %v1699_v53 = vcombine.low %v1515_v60, %v4590_v38 }
 0x215   : > { %v1476_v56 = vcombine.high %v1357_v30, %v1357_v30  ;;  %v1816_v41 = vrot.slane %v4592_v42, 5  ;;  %v1810_v52 = vrot.slane %v4597_v63, 5  ;;  %v1483_v9 = vrot.slane %v1357_v30, %v4505_v24 }
 0x216   : > { %v1499_v23 = vrot.slane %v1365_v49, %v4505_v24  ;;  %v1826_v46 = vrot.slane %v4594_v43, 5  ;;  %v1344_v59 = vrot.slane %v1328_v45, 7  ;;  %v1338_v27 = vrot.slane %v1322_v22, 7 }
 0x217   : > { %v1490_v11 = vrot.slane %v1476_v56, %v4505_v24  ;;  %v1811_v15 = vsel %vm1808_vm7, %v4516_v55, %v1810_v52  ;;  %v1713_v57 = vrot.slane %v1699_v53, %v4505_v24  ;;  %v1491_v58 = vcombine.high %v1483_v9, %v1483_v9 }
 0x218   : > { %v1698_v61 = vcombine.low %v1499_v23, %v1507_v34  ;;  %1855 = vst.msk [vmem:[%s4521_s23 + $0x10] sm:$0xff] %vm1852_vm8, %v1811_v15  ;;  %v1361_v62 = vsel %vm1353_vm10, 0.0, %v1344_v59  ;;  %v1369_v10 = vsel %vm1353_vm10, %v1344_v59, 0.0  ;;  %v1355_v8 = vsel %vm1353_vm10, 0.0, %v1338_v27 }
 0x219   : > { %v1492_v28 = vcombine.high %v1490_v11, %v1490_v11  ;;  %v1681_v45 = vcombine.low %v1483_v9, %v1491_v58  ;;  %v1572_v20 = vcombine.high %v1361_v62, %v1361_v62  ;;  %v1579_v32 = vrot.slane %v1361_v62, %v4505_v24 }
 0x21a   : > { %v1706_v22 = vrot.slane %v1698_v61, %v4505_v24  ;;  %v1595_v25 = vrot.slane %v1369_v10, %v4505_v24  ;;  %v1363_v26 = vsel %vm1353_vm10, %v1338_v27, 0.0  ;;  %v1428_v29 = vcombine.high %v1355_v8, %v1355_v8 }
 0x21b   : > { %v1682_v55 = vcombine.low %v1490_v11, %v1492_v28  ;;  %v1689_v13 = vrot.slane %v1681_v45, %v4505_v24  ;;  %v1586_v33 = vrot.slane %v1572_v20, %v4505_v24  ;;  %v1587_v18 = vcombine.high %v1579_v32, %v1579_v32 }
 0x21c   : > { %v4631_v12 = vcombine.low %v1706_v22, %v1713_v57  ;;  %v1783_v35 = vcombine.low %v1595_v25, %v4508_v16  ;;  %v1435_v34 = vrot.slane %v1355_v8, %v4505_v24  ;;  %v1442_v36 = vrot.slane %v1428_v29, %v4505_v24 }
 0x21d   : > { %v1696_v14 = vrot.slane %v1682_v55, %v4505_v24  ;;  %v1588_v39 = vcombine.high %v1586_v33, %v1586_v33  ;;  %v1766_v60 = vcombine.low %v1579_v32, %v1587_v18  ;;  %v1451_v30 = vrot.slane %v1363_v26, %v4505_v24 }
 0x21e   : > { %v1820_v37 = vrot.slane %v4631_v12, 5  ;;  %v1791_v53 = vrot.slane %v1783_v35, %v4505_v24  ;;  %v1443_v56 = vcombine.high %v1435_v34, %v1435_v34  ;;  %v1444_v9 = vcombine.high %v1442_v36, %v1442_v36 }
 0x21f   : > { %v1697_v49 = vcombine.low %v1689_v13, %v1696_v14  ;;  %v1767_v23 = vcombine.low %v1586_v33, %v1588_v39  ;;  %v1774_v11 = vrot.slane %v1766_v60, %v4505_v24  ;;  %v1648_v16 = vcombine.low %v1451_v30, %v4556_v48 }
 0x220   : > { %v1342_v59 = vrot.slane %v1326_v19, 7  ;;  %v1799_v15 = vcombine.low %v1791_v53, %v4543_v21  ;;  %v1631_v57 = vcombine.low %v1435_v34, %v1443_v56  ;;  %v1647_v58 = vcombine.low %v1442_v36, %v1444_v9 }
 0x221   : > { %v1818_v27 = vrot.slane %v1697_v49, 5  ;;  %v1781_v61 = vrot.slane %v1767_v23, %v4505_v24  ;;  %v1662_v28 = vrot.slane %v1648_v16, %v4505_v24  ;;  %v1715_v55 = vcombine.low %v1516_v44, %v1523_v47 }
 0x222   : > { %v1359_v62 = vsel %vm1353_vm10, 0.0, %v1342_v59  ;;  %v1367_v10 = vsel %vm1353_vm10, %v1342_v59, 0.0  ;;  %v1830_v19 = vrot.slane %v1799_v15, 5  ;;  %v1645_v21 = vrot.slane %v1631_v57, %v4505_v24 }
 0x223   : > { %v1819_v8 = vsel %vm1808_vm7, %v1816_v41, %v1818_v27  ;;  %v1821_v48 = vsel %vm1808_vm7, %v1818_v27, %v1820_v37  ;;  %v1782_v45 = vcombine.low %v1774_v11, %v1781_v61  ;;  %v1655_v22 = vrot.slane %v1647_v58, %v4505_v24 }
 0x224   : > { %1859 = vst.msk [vmem:[%s4521_s23 + $0x30] sm:$0xff] %vm1852_vm8, %v1819_v8  ;;  %1860 = vst.msk [vmem:[%s4521_s23 + $0x38] sm:$0xff] %vm1852_vm8, %v1821_v48  ;;  %v1524_v20 = vcombine.high %v1359_v62, %v1359_v62  ;;  %v1531_v32 = vrot.slane %v1359_v62, %v4505_v24  ;;  %v1833_v25 = vsel %vm1808_vm7, %v1830_v19, %v1832_v40 }
 0x225   : > { %v1646_v26 = vcombine.low %v1638_v50, %v1645_v21  ;;  %v1547_v29 = vrot.slane %v1367_v10, %v4505_v24  ;;  %v1828_v13 = vrot.slane %v1782_v45, 5  ;;  %v1849_v33 = vsel %vm1848_vm11, %v1833_v25, 0.0 }
 0x226   : > { %v1663_v31 = vcombine.low %v1655_v22, %v1662_v28  ;;  %v1538_v18 = vrot.slane %v1524_v20, %v4505_v24  ;;  %1866 = vst.msk [vmem:[%s4521_s23 + $0x68] sm:$0xff] %vm1852_vm8, %v1849_v33  ;;  %v1539_v40 = vcombine.high %v1531_v32, %v1531_v32  ;;  %v1723_v14 = vrot.slane %v1715_v55, %v4505_v24 }
 0x227   : > { %v1812_v17 = vrot.slane %v1646_v26, 5  ;;  %v1733_v54 = vcombine.low %v1547_v29, %v4561_v51  ;;  %v1829_v38 = vsel %vm1808_vm7, %v1826_v46, %v1828_v13  ;;  %v1831_v47 = vsel %vm1808_vm7, %v1828_v13, %v1830_v19 }
 0x228   : > { %v1814_v50 = vrot.slane %v1663_v31, 5  ;;  %v1540_v44 = vcombine.high %v1538_v18, %v1538_v18  ;;  %1864 = vst.msk [vmem:[%s4521_s23 + $0x58] sm:$0xff] %vm1852_vm8, %v1829_v38  ;;  %1865 = vst.msk [vmem:[%s4521_s23 + $0x60] sm:$0xff] %vm1852_vm8, %v1831_v47  ;;  %v1716_v34 = vcombine.low %v1531_v32, %v1539_v40 }
 0x229   : > { %v1813_v35 = vsel %vm1808_vm7, %v1810_v52, %v1812_v17  ;;  %v1747_v60 = vrot.slane %v1733_v54, %v4505_v24 }
 0x22a   : > { %v1815_v51 = vsel %vm1808_vm7, %v1812_v17, %v1814_v50  ;;  %v1817_v36 = vsel %vm1808_vm7, %v1814_v50, %v1816_v41  ;;  %1856 = vst.msk [vmem:[%s4521_s23 + $0x18] sm:$0xff] %vm1852_vm8, %v1813_v35  ;;  %v1732_v39 = vcombine.low %v1538_v18, %v1540_v44  ;;  %v1730_v63 = vrot.slane %v1716_v34, %v4505_v24 }
 0x22b   : > { %1857 = vst.msk [vmem:[%s4521_s23 + $0x20] sm:$0xff] %vm1852_vm8, %v1815_v51  ;;  %1858 = vst.msk [vmem:[%s4521_s23 + $0x28] sm:$0xff] %vm1852_vm8, %v1817_v36 }
 0x22c   : > { %v1740_v52 = vrot.slane %v1732_v39, %v4505_v24  ;;  %v1731_v30 = vcombine.low %v1723_v14, %v1730_v63 }
 0x22e   : > { %v1748_v42 = vcombine.low %v1740_v52, %v1747_v60  ;;  %v1822_v49 = vrot.slane %v1731_v30, 5 }
 0x230   : > { %v1824_v53 = vrot.slane %v1748_v42, 5  ;;  %v1823_v41 = vsel %vm1808_vm7, %v1820_v37, %v1822_v49 }
 0x231   : > { %1861 = vst.msk [vmem:[%s4521_s23 + $0x40] sm:$0xff] %vm1852_vm8, %v1823_v41 }
 0x232   : > { %v1825_v56 = vsel %vm1808_vm7, %v1822_v49, %v1824_v53  ;;  %v1827_v9 = vsel %vm1808_vm7, %v1824_v53, %v1826_v46 }
 0x233   : > { %1862 = vst.msk [vmem:[%s4521_s23 + $0x48] sm:$0xff] %vm1852_vm8, %v1825_v56  ;;  %1863 = vst.msk [vmem:[%s4521_s23 + $0x50] sm:$0xff] %vm1852_vm8, %v1827_v9 }
 0x234 PF: > { %p3749_p12 = scmp.ne.s32.totalorder %s4218_s24, 4 }
 0x235   : > { %s3750_s25 = sshll.u32 (!%p3749_p12), %s5683_s29, 7  ;;  %vm1876_vm12 = vcmask (!%p3749_p12), 31744   ;;  %vm1892_vm13 = vcmask (!%p3749_p12), 25600   ;;  %v4110_v24 = vmov (!%p3749_p12), 0.0  }
 0x236   : > { %1873 = sbr.rel (%p3749_p12) target bundleno = 576 (0x240), region = 76  ;;  %s1875_s27 = scalar_lea.vmem (!%p3749_p12), [#allocation2], %s3750_s25 }
 0x237   : > { %1877 = vst.msk [vmem:[%s1875_s27] sm:$0xff] (!%p3749_p12), %vm1876_vm12, %v4110_v24  ;;  %1878 = vst.msk [vmem:[%s1875_s27 + $0x8] sm:$0xff] (!%p3749_p12), %vm1876_vm12, %v4110_v24 }
 0x238   : > { %1879 = vst.msk [vmem:[%s1875_s27 + $0x10] sm:$0xff] (!%p3749_p12), %vm1876_vm12, %v4110_v24  ;;  %1880 = vst.msk [vmem:[%s1875_s27 + $0x18] sm:$0xff] (!%p3749_p12), %vm1876_vm12, %v4110_v24 }
 0x239   : > { %1881 = vst.msk [vmem:[%s1875_s27 + $0x20] sm:$0xff] (!%p3749_p12), %vm1876_vm12, %v4110_v24  ;;  %1882 = vst.msk [vmem:[%s1875_s27 + $0x28] sm:$0xff] (!%p3749_p12), %vm1876_vm12, %v4110_v24 }
 0x23a   : > { %1883 = vst.msk [vmem:[%s1875_s27 + $0x30] sm:$0xff] (!%p3749_p12), %vm1876_vm12, %v4110_v24  ;;  %1884 = vst.msk [vmem:[%s1875_s27 + $0x38] sm:$0xff] (!%p3749_p12), %vm1876_vm12, %v4110_v24 }
 0x23b   : > { %1885 = vst.msk [vmem:[%s1875_s27 + $0x40] sm:$0xff] (!%p3749_p12), %vm1876_vm12, %v4110_v24  ;;  %1886 = vst.msk [vmem:[%s1875_s27 + $0x48] sm:$0xff] (!%p3749_p12), %vm1876_vm12, %v4110_v24 }
 0x23c   : > { %1887 = vst.msk [vmem:[%s1875_s27 + $0x50] sm:$0xff] (!%p3749_p12), %vm1876_vm12, %v4110_v24  ;;  %1888 = vst.msk [vmem:[%s1875_s27 + $0x58] sm:$0xff] (!%p3749_p12), %vm1876_vm12, %v4110_v24 }
 0x23d   : > { %1889 = vst.msk [vmem:[%s1875_s27 + $0x60] sm:$0xff] %vm1876_vm12, %v4110_v24  ;;  %1890 = vst.msk [vmem:[%s1875_s27 + $0x68] sm:$0xff] %vm1876_vm12, %v4110_v24 }
 0x23e   : > { %1891 = vst.msk [vmem:[%s1875_s27 + $0x70] sm:$0xff] %vm1876_vm12, %v4110_v24 }
 0x23f   : > { %1893 = vst.msk [vmem:[%s1875_s27 + $0x78] sm:$0x3] %vm1892_vm13, %v4110_v24 }
 0x240 PF: > { %s3759_s24 = sshll.u32 %s5683_s29, 7  ;;  %s1927_s12 = ssub.s32 0, %s4088_s17  ;;  %vm2103_vm14 = vcmask 31744   ;;  %vm2120_vm15 = vcmask 64512   ;;  %vm2231_vm0 = vcmask 1046528   ;;  %vm2370_vm1 = vcmask 1045504  }
 0x241   : > { %s4736_s28 = scalar_lea.vmem [#allocation2], %s3759_s24  ;;  %s3755_s29 = smin.u32 %s4088_s17, %s1927_s12  ;;  %vm2480_vm2 = vcmask 1044480   ;;  %vm2154_vm3 = vsmask.f32 7424  ;;  %vm2293_vm4 = vsmask.f32 6400 }
 0x242   : > { %s4747_s14 = sadd.s32 2, %s4088_s17  ;;  %4062 = sdivrem.u32 %s3755_s29, 3  ;;  %vm2427_vm5 = vsmask.f32 5376  ;;  %vm4120_vm6 = vmmov 0   ;;  %vm2508_vm7 = vcmask 97280  }
 0x243   : > { %s1896_s30 = ssub.s32 0, %s4747_s14  ;;  %s4111_s23 = smov 8   ;;  %vm2523_vm8 = vcmask 195584   ;;  %vm2538_vm9 = vcmask 293888   ;;  %vm2553_vm10 = vcmask 392192   ;;  %vm2568_vm11 = vcmask 490496  }
 0x244   : > { %s3751_s26 = smin.u32 %s1896_s30, %s4747_s14  ;;  %p1926_p13 = scmp.lt.s32.totalorder %s4088_s17, 0  ;;  %vm2583_vm12 = vcmask 588800   ;;  %vm2598_vm13 = vcmask 687104  }
 0x245   : > { %4064 = sdivrem.u32 %s3751_s26, 3  ;;  %s4112_s17 = smov 4  }
 0x246   : > { %v1963_v43 = vld [vmem:[%s4736_s28 + $0x20] sm:$0xff]  ;;  %v1964_v46 = vld [vmem:[%s4736_s28 + $0x28] sm:$0xff]  ;;  %v1965_v12 = vld [vmem:[%s4736_s28 + $0x30] sm:$0xff]  ;;  %p1895_p1 = scmp.lt.s32.totalorder %s4747_s14, 0  ;;  %s4113_s14 = smov 24  }
 0x247   : > { %v3985_v37 = vpack.i.bf16 %v1964_v46, %v1963_v43  ;;  %v1966_v23 = vld [vmem:[%s4736_s28 + $0x38] sm:$0xff]  ;;  %v1959_v11 = vld [vmem:[%s4736_s28] sm:$0xff]  ;;  %v1960_v16 = vld [vmem:[%s4736_s28 + $0x8] sm:$0xff]  ;;  %s4115_s26 = smov 72  }
 0x248   : > { %v3975_v59 = vpack.i.bf16 %v1960_v16, %v1959_v11  ;;  %v1961_v27 = vld [vmem:[%s4736_s28 + $0x10] sm:$0xff]  ;;  %v3990_v15 = vpack.i.bf16 %v1966_v23, %v1965_v12  ;;  %v1962_v57 = vld [vmem:[%s4736_s28 + $0x18] sm:$0xff]  ;;  %v1967_v58 = vld [vmem:[%s4736_s28 + $0x40] sm:$0xff] }
 0x249   : > { %3986 = vrot.lane.b32.xlu1 %v3985_v37, %s4111_s23  ;;  %v1968_v61 = vld [vmem:[%s4736_s28 + $0x48] sm:$0xff]  ;;  %v3980_v28 = vpack.i.bf16 %v1962_v57, %v1961_v27  ;;  %v1969_v25 = vld [vmem:[%s4736_s28 + $0x50] sm:$0xff]  ;;  %v1970_v26 = vld [vmem:[%s4736_s28 + $0x58] sm:$0xff] }
 0x24a   : > { %3976 = vrot.lane.b32.xlu0 %v3975_v59, %s4111_s23  ;;  %v3995_v62 = vpack.i.bf16 %v1968_v61, %v1967_v58  ;;  %v4015_v18 = vpack.i.bf16 %v1970_v26, %v1969_v25  ;;  %v1971_v17 = vld [vmem:[%s4736_s28 + $0x60] sm:$0xff]  ;;  %v1972_v40 = vld [vmem:[%s4736_s28 + $0x68] sm:$0xff]  ;;  %v1973_v44 = vld [vmem:[%s4736_s28 + $0x70] sm:$0xff] }
 0x24b   : > { %s4063_s13 = spop.drf %4062  ;;  %v4040_v50 = vpack.i.bf16 %v1972_v40, %v1971_v17  ;;  %v1974_v14 = vld [vmem:[%s4736_s28 + $0x78] sm:$0x3] }
 0x24c   : > { %s1931_s15 = ssub.s32 0, %s4063_s13  ;;  %v4050_v36 = vpack.i.bf16 %v1974_v14, %v1973_v44 }
 0x24d   : > { %3991 = vrot.lane.b32.xlu1 %v3990_v15, %s4111_s23  ;;  %s5685_s15 = smov (!%p1926_p13, %s1931_s15), %s4063_s13  ;;  %s4116_s13 = smov 60  }
 0x24e   : > { %3981 = vrot.lane.b32.xlu0 %v3980_v28, %s4111_s23  ;;  %p3757_p0 = scmp.lt.s32.totalorder %s5685_s15, 0  ;;  %s1937_s18 = sadd.s32 3, %s5685_s15 }
 0x24f   : > { %s4065_s24 = spop.drf %4064 }
 0x250   : > { %s5687_s18 = smov (!%p3757_p0, %s1937_s18), %s5685_s15  ;;  %s1900_s28 = ssub.s32 0, %s4065_s24 }
 0x251   : > { %3996 = vrot.lane.b32.xlu1 %v3995_v62, %s4111_s23  ;;  %s3758_s25 = sshll.u32 %s5687_s18, 7  ;;  %s5689_s28 = smov (!%p1895_p1, %s1900_s28), %s4065_s24 }
 0x252   : > { %s4761_s27 = scalar_lea.vmem [#allocation2], %s3758_s25  ;;  %p3753_p2 = scmp.lt.s32.totalorder %s5689_s28, 0 }
 0x253   : > { %v1943_v10 = vld [vmem:[%s4761_s27 + $0x10] sm:$0xff]  ;;  %v1944_v8 = vld [vmem:[%s4761_s27 + $0x18] sm:$0xff]  ;;  %v1941_v48 = vld [vmem:[%s4761_s27] sm:$0xff]  ;;  %s1906_s12 = sadd.s32 3, %s5689_s28  ;;  %s4117_s15 = smov 96  }
 0x254   : > { %v4005_v19 = vpack.i.bf16 %v1944_v8, %v1943_v10  ;;  %v1942_v21 = vld [vmem:[%s4761_s27 + $0x8] sm:$0xff]  ;;  %v1945_v22 = vld [vmem:[%s4761_s27 + $0x20] sm:$0xff]  ;;  %v1947_v32 = vld [vmem:[%s4761_s27 + $0x30] sm:$0xff]  ;;  %s5691_s12 = smov (!%p3753_p2, %s1906_s12), %s5689_s28  ;;  %s4118_s18 = smov 12  }
 0x255   : > { %v4000_v45 = vpack.i.bf16 %v1942_v21, %v1941_v48  ;;  %v1946_v20 = vld [vmem:[%s4761_s27 + $0x28] sm:$0xff]  ;;  %v1948_v55 = vld [vmem:[%s4761_s27 + $0x38] sm:$0xff]  ;;  %v1949_v33 = vld [vmem:[%s4761_s27 + $0x40] sm:$0xff]  ;;  %s3754_s29 = sshll.u32 %s5691_s12, 7  ;;  %s4121_s28 = smov 48  }
 0x256   : > { %4006 = vrot.lane.b32.xlu1 %v4005_v19, %s4112_s17  ;;  %v4010_v29 = vpack.i.bf16 %v1946_v20, %v1945_v22  ;;  %v4020_v13 = vpack.i.bf16 %v1948_v55, %v1947_v32  ;;  %v1950_v31 = vld [vmem:[%s4761_s27 + $0x48] sm:$0xff]  ;;  %v1951_v38 = vld [vmem:[%s4761_s27 + $0x50] sm:$0xff]  ;;  %v1952_v47 = vld [vmem:[%s4761_s27 + $0x58] sm:$0xff]  ;;  %s4801_s30 = scalar_lea.vmem [#allocation2], %s3754_s29  ;;  %s4122_s12 = smov 84  }
 0x257   : > { %4001 = vrot.lane.b32.xlu0 %v4000_v45, %s4112_s17  ;;  %v4025_v54 = vpack.i.bf16 %v1950_v31, %v1949_v33  ;;  %v4030_v35 = vpack.i.bf16 %v1952_v47, %v1951_v38  ;;  %v1953_v34 = vld [vmem:[%s4761_s27 + $0x60] sm:$0xff]  ;;  %v1954_v51 = vld [vmem:[%s4761_s27 + $0x68] sm:$0xff]  ;;  %v1955_v63 = vld [vmem:[%s4761_s27 + $0x70] sm:$0xff] }
 0x258   : > { %v4035_v39 = vpack.i.bf16 %v1954_v51, %v1953_v34  ;;  %v1956_v52 = vld [vmem:[%s4761_s27 + $0x78] sm:$0x3]  ;;  %v1912_v43 = vld [vmem:[%s4801_s30 + $0x10] sm:$0xff]  ;;  %v1910_v11 = vld [vmem:[%s4801_s30] sm:$0xff] }
 0x259   : > { %v4045_v60 = vpack.i.bf16 %v1956_v52, %v1955_v63  ;;  %v1913_v46 = vld [vmem:[%s4801_s30 + $0x18] sm:$0xff]  ;;  %v1911_v16 = vld [vmem:[%s4801_s30 + $0x8] sm:$0xff]  ;;  %v1914_v33 = vld [vmem:[%s4801_s30 + $0x20] sm:$0xff] }
 0x25a   : > { %4011 = vrot.lane.b32.xlu1 %v4010_v29, %s4112_s17  ;;  %v1915_v29 = vld [vmem:[%s4801_s30 + $0x28] sm:$0xff]  ;;  %v1916_v47 = vld [vmem:[%s4801_s30 + $0x30] sm:$0xff] }
 0x25b   : > { %4021 = vrot.lane.b32.xlu0 %v4020_v13, %s4112_s17 }
 0x25e   : > { %4016 = vrot.lane.b32.xlu1 %v4015_v18, %s4111_s23 }
 0x25f   : > { %4026 = vrot.lane.b32.xlu0 %v4025_v54, %s4112_s17 }
 0x262   : > { %4041 = vrot.lane.b32.xlu1 %v4040_v50, %s4111_s23 }
 0x263   : > { %4031 = vrot.lane.b32.xlu0 %v4030_v35, %s4112_s17 }
 0x266   : > { %4051 = vrot.lane.b32.xlu1 %v4050_v36, %s4111_s23  ;;  %s4114_s23 = smov 36  }
 0x267   : > { %4036 = vrot.lane.b32.xlu0 %v4035_v39, %s4112_s17  ;;  %v1917_v39 = vld [vmem:[%s4801_s30 + $0x38] sm:$0xff] }
 0x26b   : > { %4046 = vrot.lane.b32.xlu0 %v4045_v60, %s4112_s17 }
 0x2bb   : > { %v3987_v30 = vpop.permute.xlu1 %3986 }
 0x2bc   : > { %v3977_v49 = vpop.permute.xlu0 %3976  ;;  %v3989_v32 = vunpack.i.h.bf16 %v3987_v30  ;;  %v3988_v55 = vunpack.i.l.bf16 %v3987_v30 }
 0x2bd   : > { %v3979_v15 = vunpack.i.h.bf16 %v3977_v49  ;;  %v3978_v57 = vunpack.i.l.bf16 %v3977_v49 }
 0x2bf   : > { %v4797_v42 = vpop.permute.xlu1 %3991 }
 0x2c0   : > { %v3982_v41 = vpop.permute.xlu0 %3981  ;;  %v3993_v34 = vunpack.i.l.bf16 %v4797_v42 }
 0x2c1   : > { %v3984_v56 = vunpack.i.h.bf16 %v3982_v41  ;;  %v3983_v9 = vunpack.i.l.bf16 %v3982_v41 }
 0x2c3   : > { %v4799_v53 = vpop.permute.xlu1 %3996 }
 0x2c8   : > { %v4007_v24 = vpop.permute.xlu1 %4006 }
 0x2c9   : > { %v4009_v12 = vunpack.i.h.bf16 %v4007_v24  ;;  %v4008_v37 = vunpack.i.l.bf16 %v4007_v24  ;;  %v4002_v23 = vpop.permute.xlu0 %4001 }
 0x2ca   : > { %v4004_v59 = vunpack.i.h.bf16 %v4002_v23  ;;  %v4003_v27 = vunpack.i.l.bf16 %v4002_v23 }
 0x2cb   : > { %v2106_v58 = vsel %vm2103_vm14, %v1912_v43, %v4008_v37  ;;  %v2107_v61 = vsel %vm2103_vm14, %v1913_v46, %v4009_v12  ;;  %v1918_v12 = vld [vmem:[%s4801_s30 + $0x40] sm:$0xff] }
 0x2cc   : > { %v2123_v28 = vsel %vm2120_vm15, %v2106_v58, %v3983_v9  ;;  %v2124_v62 = vsel %vm2120_vm15, %v2107_v61, %v3984_v56  ;;  %v2104_v10 = vsel %vm2103_vm14, %v1910_v11, %v4003_v27  ;;  %v2105_v8 = vsel %vm2103_vm14, %v1911_v16, %v4004_v59  ;;  %v4012_v48 = vpop.permute.xlu1 %4011 }
 0x2cd   : > { %v4813_v19 = vpack.c.bf16 %v2124_v62, %v2123_v28  ;;  %v2121_v21 = vsel %vm2120_vm15, %v2104_v10, %v3978_v57  ;;  %v2122_v45 = vsel %vm2120_vm15, %v2105_v8, %v3979_v15  ;;  %v4014_v22 = vunpack.i.h.bf16 %v4012_v48  ;;  %v4022_v20 = vpop.permute.xlu0 %4021 }
 0x2ce   : > { %v4817_v25 = vpack.c.bf16 %v2122_v45, %v2121_v21  ;;  %v4013_v26 = vunpack.i.l.bf16 %v4012_v48  ;;  %v4820_v13 = vpack.c.bf16 %v2123_v28, %v2122_v45  ;;  %v4023_v18 = vunpack.i.l.bf16 %v4022_v20 }
 0x2cf   : > { %v2109_v31 = vsel %vm2103_vm14, %v1915_v29, %v4014_v22  ;;  %v2233_v17 = vrot.slane %v4813_v19, 1  ;;  %v4024_v38 = vunpack.i.h.bf16 %v4022_v20  ;;  %v3994_v9 = vunpack.i.h.bf16 %v4797_v42  ;;  %v1920_v29 = vld [vmem:[%s4801_s30 + $0x50] sm:$0xff] }
 0x2d0   : > { %v2108_v40 = vsel %vm2103_vm14, %v1914_v33, %v4013_v26  ;;  %v2126_v54 = vsel %vm2120_vm15, %v2109_v31, %v3989_v32  ;;  %v2232_v50 = vrot.slane %v4817_v25, 1  ;;  %v2110_v14 = vsel %vm2103_vm14, %v1916_v47, %v4023_v18  ;;  %v4843_v49 = vpop.permute.xlu1 %4016  ;;  %v1919_v32 = vld [vmem:[%s4801_s30 + $0x48] sm:$0xff] }
 0x2d1   : > { %v2125_v44 = vsel %vm2120_vm15, %v2108_v40, %v3988_v55  ;;  %v4027_v35 = vpop.permute.xlu0 %4026  ;;  %v2111_v60 = vsel %vm2103_vm14, %v1917_v39, %v4024_v38  ;;  %v2127_v30 = vsel %vm2120_vm15, %v2110_v14, %v3993_v34  ;;  %v2266_v41 = vrot.slane %v4820_v13, 1 }
 0x2d2   : > { %v4832_v51 = vpack.c.bf16 %v2126_v54, %v2125_v44  ;;  %v4834_v36 = vpack.c.bf16 %v2125_v44, %v2124_v62  ;;  %v4028_v63 = vunpack.i.l.bf16 %v4027_v35  ;;  %v2234_v52 = vsel %vm2231_vm0, %v2232_v50, %v2233_v17 }
 0x2d3   : > { %2245 = vrot.lane.b32.xlu1 %v2234_v52, %s4113_s14  ;;  %v2400_v43 = vrot.slane %v4813_v19, 2  ;;  %v2128_v23 = vsel %vm2120_vm15, %v2111_v60, %v3994_v9  ;;  %v4855_v11 = vpack.c.bf16 %v2127_v30, %v2126_v54  ;;  %v3998_v59 = vunpack.i.l.bf16 %v4799_v53 }
 0x2d4   : > { %v2267_v56 = vrot.slane %v4834_v36, 1  ;;  %v2401_v46 = vrot.slane %v4832_v51, 2  ;;  %v2112_v16 = vsel %vm2103_vm14, %v1918_v12, %v4028_v63  ;;  %v2372_v27 = vrot.slane %v4834_v36, 2  ;;  %v4872_v48 = vpop.permute.xlu1 %4041  ;;  %v1921_v12 = vld [vmem:[%s4801_s30 + $0x58] sm:$0xff] }
 0x2d5   : > { %v4848_v24 = vpop.permute.xlu0 %4031  ;;  %v4029_v15 = vunpack.i.h.bf16 %v4027_v35  ;;  %v2371_v58 = vrot.slane %v4820_v13, 2  ;;  %v2481_v61 = vrot.slane %v4813_v19, 3  ;;  %v2482_v28 = vrot.slane %v4832_v51, 3 }
 0x2d6   : > { %v2268_v37 = vsel %vm2231_vm0, %v2266_v41, %v2267_v56  ;;  %v2402_v42 = vsel %vm2370_vm1, %v2400_v43, %v2401_v46  ;;  %v4868_v62 = vpack.c.bf16 %v2128_v23, %v2127_v30  ;;  %v2129_v10 = vsel %vm2120_vm15, %v2112_v16, %v3998_v59  ;;  %v1924_v30 = vld [vmem:[%s4801_s30 + $0x70] sm:$0xff]  ;;  %v1925_v41 = vld [vmem:[%s4801_s30 + $0x78] sm:$0x3] }
 0x2d7   : > { %2279 = vrot.lane.b32.xlu0 %v2268_v37, %s4114_s23  ;;  %2413 = vrot.lane.b32.xlu1 %v2402_v42, %s4115_s26  ;;  %v4033_v8 = vunpack.i.l.bf16 %v4848_v24  ;;  %v2373_v21 = vsel %vm2370_vm1, %v2371_v58, %v2372_v27  ;;  %v2483_v45 = vsel %vm2480_vm2, %v2481_v61, %v2482_v28  ;;  %v2269_v22 = vrot.slane %v4855_v11, 1 }
 0x2d8   : > { %v2235_v20 = vrot.slane %v4832_v51, 1  ;;  %v3999_v55 = vunpack.i.h.bf16 %v4799_v53  ;;  %v2113_v26 = vsel %vm2103_vm14, %v1919_v32, %v4029_v15  ;;  %v4018_v33 = vunpack.i.l.bf16 %v4843_v49  ;;  %v4052_v44 = vpop.permute.xlu1 %4051 }
 0x2d9   : > { %v4863_v57 = vpop.permute.xlu0 %4036  ;;  %v4885_v31 = vpack.c.bf16 %v2129_v10, %v2128_v23  ;;  %v2114_v18 = vsel %vm2103_vm14, %v1920_v29, %v4033_v8  ;;  %v2374_v40 = vrot.slane %v4855_v11, 2  ;;  %v2403_v54 = vrot.slane %v4868_v62, 2 }
 0x2da   : > { %v2270_v47 = vsel %vm2231_vm0, %v2267_v56, %v2269_v22  ;;  %v2236_v53 = vsel %vm2231_vm0, %v2233_v17, %v2235_v20  ;;  %v2130_v50 = vsel %vm2120_vm15, %v2113_v26, %v3999_v55  ;;  %v4034_v14 = vunpack.i.h.bf16 %v4848_v24 }
 0x2db   : > { %2384 = vrot.lane.b32.xlu0 %v2373_v21, %s4116_s13  ;;  %2494 = vrot.lane.b32.xlu1 %v2483_v45, %s4117_s15  ;;  %v2131_v35 = vsel %vm2120_vm15, %v2114_v18, %v4018_v33  ;;  %v2375_v63 = vsel %vm2370_vm1, %v2372_v27, %v2374_v40  ;;  %v2404_v52 = vsel %vm2370_vm1, %v2401_v46, %v2403_v54  ;;  %v2271_v17 = vrot.slane %v4885_v31, 1  ;;  %v1922_v21 = vld [vmem:[%s4801_s30 + $0x60] sm:$0xff]  ;;  %v1923_v45 = vld [vmem:[%s4801_s30 + $0x68] sm:$0xff] }
 0x2dc   : > { %v2484_v60 = vrot.slane %v4868_v62, 3  ;;  %v4054_v43 = vunpack.i.h.bf16 %v4052_v44  ;;  %v4053_v24 = vunpack.i.l.bf16 %v4052_v44  ;;  %v4019_v37 = vunpack.i.h.bf16 %v4843_v49 }
 0x2dd   : > { %v4047_v38 = vpop.permute.xlu0 %4046  ;;  %v2115_v46 = vsel %vm2103_vm14, %v1921_v12, %v4034_v14  ;;  %v4912_v23 = vpack.c.bf16 %v2130_v50, %v2129_v10  ;;  %v4916_v59 = vpack.c.bf16 %v2131_v35, %v2130_v50  ;;  %v4039_v27 = vunpack.i.h.bf16 %v4863_v57 }
 0x2de   : > { %v4049_v34 = vunpack.i.h.bf16 %v4047_v38  ;;  %v4048_v39 = vunpack.i.l.bf16 %v4047_v38  ;;  %v4038_v49 = vunpack.i.l.bf16 %v4863_v57  ;;  %v2272_v58 = vsel %vm2231_vm0, %v2269_v22, %v2271_v17 }
 0x2df   : > { %2281 = vrot.lane.b32.xlu0 %v2270_v47, %s4114_s23  ;;  %2247 = vrot.lane.b32.xlu1 %v2236_v53, %s4113_s14  ;;  %v2485_v61 = vsel %vm2480_vm2, %v2482_v28, %v2484_v60  ;;  %v2376_v8 = vrot.slane %v4885_v31, 2  ;;  %v2237_v10 = vrot.slane %v4868_v62, 1  ;;  %v4044_v32 = vunpack.i.h.bf16 %v4872_v48 }
 0x2e0   : > { %v2118_v56 = vsel %vm2103_vm14, %v1924_v30, %v4048_v39  ;;  %v2119_v9 = vsel %vm2103_vm14, %v1925_v41, %v4049_v34  ;;  %v2132_v57 = vsel %vm2120_vm15, %v2115_v46, %v4019_v37  ;;  %v2116_v55 = vsel %vm2103_vm14, %v1922_v21, %v4038_v49 }
 0x2e1   : > { %v2135_v16 = vsel %vm2120_vm15, %v2118_v56, %v4053_v24  ;;  %v2136_v42 = vsel %vm2120_vm15, %v2119_v9, %v4054_v43  ;;  %v2117_v22 = vsel %vm2103_vm14, %v1923_v45, %v4039_v27  ;;  %v4043_v28 = vunpack.i.l.bf16 %v4872_v48 }
 0x2e2   : > { %v4920_v15 = vpack.c.bf16 %v2136_v42, %v2135_v16  ;;  %v2377_v26 = vsel %vm2370_vm1, %v2374_v40, %v2376_v8  ;;  %v2238_v29 = vsel %vm2231_vm0, %v2235_v20, %v2237_v10  ;;  %v2273_v33 = vrot.slane %v4916_v59, 1 }
 0x2e3   : > { %2386 = vrot.lane.b32.xlu0 %v2375_v63, %s4116_s13  ;;  %2415 = vrot.lane.b32.xlu1 %v2404_v52, %s4115_s26  ;;  %v2405_v18 = vrot.slane %v4912_v23, 2  ;;  %v4941_v38 = vpack.c.bf16 %v2132_v57, %v2131_v35  ;;  %v2133_v47 = vsel %vm2120_vm15, %v2116_v55, %v4043_v28  ;;  %v2134_v53 = vsel %vm2120_vm15, %v2117_v22, %v4044_v32 }
 0x2e4   : > { %v2274_v48 = vsel %vm2231_vm0, %v2271_v17, %v2273_v33  ;;  %v2378_v20 = vrot.slane %v4916_v59, 2  ;;  %v2486_v50 = vrot.slane %v4912_v23, 3  ;;  %v4951_v44 = vpack.c.bf16 %v2133_v47, %v2132_v57 }
 0x2e5   : > { %v2406_v40 = vsel %vm2370_vm1, %v2403_v54, %v2405_v18  ;;  %v4953_v14 = vpack.c.bf16 %v2134_v53, %v2133_v47  ;;  %v2239_v39 = vrot.slane %v4912_v23, 1  ;;  %v2241_v54 = vrot.slane %v4941_v38, 1 }
 0x2e6   : > { %v2379_v35 = vsel %vm2370_vm1, %v2376_v8, %v2378_v20  ;;  %v2487_v34 = vsel %vm2480_vm2, %v2484_v60, %v2486_v50  ;;  %v2158_v63 = vshll.u32 %v4817_v25, 16  ;;  %v2152_v52 = vpack.c.bf16 %v2135_v16, %v2135_v16 }
 0x2e7   : > { %2283 = vrot.lane.b32.xlu0 %v2272_v58, %s4114_s23  ;;  %2496 = vrot.lane.b32.xlu1 %v2485_v61, %s4117_s15  ;;  %v2275_v17 = vrot.slane %v4951_v44, 1  ;;  %v2407_v30 = vrot.slane %v4941_v38, 2  ;;  %v2409_v41 = vrot.slane %v4953_v14, 2  ;;  %v4967_v60 = vpack.c.bf16 %v2133_v47, %v2133_v47 }
 0x2e8   : > { %v4965_v56 = vrot.slane %v2152_v52, 2  ;;  %v4969_v9 = vpack.c.bf16 %v2134_v53, %v2134_v53  ;;  %v2242_v43 = vsel %vm2231_vm0, %v2239_v39, %v2241_v54  ;;  %v2240_v24 = vsel %vm2231_vm0, %v2237_v10, %v2239_v39 }
 0x2e9   : > { %v2160_v12 = vrot.slane %v2158_v63, 1  ;;  %v2276_v46 = vsel %vm2231_vm0, %v2273_v33, %v2275_v17  ;;  %v2408_v16 = vsel %vm2370_vm1, %v2405_v18, %v2407_v30  ;;  %v2156_v42 = vshrl.u32 %v4817_v25, 16 }
 0x2ea   : > { %v4977_v37 = vsel %vm2370_vm1, %v2409_v41, %v4965_v56  ;;  %v2163_v27 = vshll.u32 %v4813_v19, 16  ;;  %v2380_v49 = vrot.slane %v4951_v44, 2  ;;  %v2488_v58 = vrot.slane %v4941_v38, 3 }
 0x2eb   : > { %2388 = vrot.lane.b32.xlu0 %v2377_v26, %s4116_s13  ;;  %2249 = vrot.lane.b32.xlu1 %v2238_v29, %s4113_s14  ;;  %v2243_v61 = vrot.slane %v4967_v60, 1  ;;  %v2277_v8 = vrot.slane %v4969_v9, 1  ;;  %v2161_v10 = vor.u32 %v2160_v12, %v2156_v42  ;;  %v2295_v21 = vshrl.u32 %v4820_v13, 16 }
 0x2ec   : > { %v2298_v45 = vshll.u32 %v4820_v13, 16  ;;  %v2303_v32 = vshrl.u32 %v4834_v36, 16  ;;  %v2306_v57 = vshll.u32 %v4834_v36, 16  ;;  %v4993_v55 = vrot.slane %v2163_v27, 1 }
 0x2ed   : > { %v2171_v22 = vshll.u32 %v4832_v51, 16  ;;  %v2175_v28 = vshrl.u32 %v4832_v51, 16  ;;  %v2381_v26 = vsel %vm2370_vm1, %v2378_v20, %v2380_v49  ;;  %v2489_v29 = vsel %vm2480_vm2, %v2486_v50, %v2488_v58 }
 0x2ee   : > { %v2244_v13 = vsel %vm2231_vm0, %v2241_v54, %v2243_v61  ;;  %v2278_v36 = vsel %vm2231_vm0, %v2275_v17, %v2277_v8  ;;  %v2166_v33 = vsel %vm2154_vm3, %v2161_v10, %v4993_v55  ;;  %v2297_v18 = vrot.slane %v2295_v21, 1 }
 0x2ef   : > { %2285 = vrot.lane.b32.xlu0 %v2274_v48, %s4114_s23  ;;  %2417 = vrot.lane.b32.xlu1 %v2406_v40, %s4115_s26  ;;  %v2300_v47 = vrot.slane %v2298_v45, 2  ;;  %v2167_v53 = vshrl.u32 %v4813_v19, 16  ;;  %v2305_v48 = vrot.slane %v2303_v32, 1  ;;  %v2308_v40 = vrot.slane %v2306_v57, 2  ;;  %v4055_v45 = vld [vmem:[%s5655_s5] sm:$0xff]  }
 0x2f0   : > { %v2448_v20 = vshrl.u32 %v4953_v14, 16  ;;  %v2451_v50 = vshll.u32 %v4953_v14, 16  ;;  %v2457_v39 = vshrl.u32 %v4920_v15, 16  ;;  %v2460_v54 = vshll.u32 %v4920_v15, 16 }
 0x2f1   : > { %v2490_v17 = vrot.slane %v4953_v14, 3  ;;  %v2429_v12 = vrot.slane %v2163_v27, 3  ;;  %v2410_v42 = vsel %vm2370_vm1, %v2407_v30, %v2409_v41  ;;  %v5023_v10 = vor.u32 %v2308_v40, %v2305_v48 }
 0x2f2   : > { %v2450_v63 = vrot.slane %v2448_v20, 2  ;;  %v2453_v52 = vrot.slane %v2451_v50, 3  ;;  %v2312_v30 = vshrl.u32 %v4855_v11, 16  ;;  %v2315_v41 = vshll.u32 %v4855_v11, 16  ;;  %v4056_v11 = vld [vmem:[%s5655_s5 + $0x8] sm:$0xff]  }
 0x2f3   : > { %2390 = vrot.lane.b32.xlu0 %v2379_v35, %s4116_s13  ;;  %2498 = vrot.lane.b32.xlu1 %v2487_v34, %s4117_s15  ;;  %v2431_v35 = vrot.slane %v2175_v28, 2  ;;  %v2432_v34 = vrot.slane %v2171_v22, 3  ;;  %v5031_v14 = vsel %vm2480_vm2, %v2488_v58, %v2490_v17  ;;  %v4119_v58 = vmov 0.0  }
 0x2f4   : > { %v5038_v27 = vor.u32 %v2453_v52, %v2450_v63  ;;  %3841 = vmatprep.subr.bf16.mxu0 %v4119_v58  ;;  %3897 = vmatprep.subr.bf16.mxu1 %v4119_v58  ;;  %v2314_v20 = vrot.slane %v2312_v30, 1  ;;  %v2317_v50 = vrot.slane %v2315_v41, 2  ;;  %v2187_v63 = vshll.u32 %v4912_v23, 16 }
 0x2f5   : > { %v5036_v32 = vor.u32 %v2432_v34, %v2431_v35  ;;  %3842 = vmatpush3.bf16.msra.mxu0 %v4055_v45  ;;  %3904 = vmatpush3.bf16.msra.mxu1 %v4055_v45  ;;  %v2191_v52 = vshrl.u32 %v4912_v23, 16  ;;  %v4058_v45 = vld [vmem:[%s5655_s5 + $0x18] sm:$0xff]   ;;  %v2333_v30 = vshll.u32 %v4916_v59, 16  ;;  %vm2613_vm15 = vcmask 785408  }
 0x2f6   : > { %3843 = vmatprep.subr.bf16.mxu0 %v4119_v58  ;;  %3855 = vmatprep.mubr.msk.bf16.mxu0 %vm4120_vm6, %v4119_v58  ;;  %vm2683_vm0 = vcmask 883712  }
 0x2f7   : > { %2253 = vrot.lane.b32.xlu0 %v2242_v43, %s4113_s14  ;;  %2251 = vrot.lane.b32.xlu1 %v2240_v24, %s4113_s14  ;;  %v2492_v43 = vrot.slane %v4920_v15, 3  ;;  %v2428_v24 = vrot.slane %v2167_v53, 2 }
 0x2f8   : > { %3898 = vmatprep.subr.bf16.mxu1 %v4119_v58  ;;  %3875 = vmatprep.mubr.msk.bf16.mxu1 %vm4120_vm6, %v4119_v58 }
 0x2f9   : > { %v5028_v21 = vsel %vm2480_vm2, %v2490_v17, %v2492_v43  ;;  %3844 = vmatpush3.bf16.msra.mxu0 %v4056_v11  ;;  %v4057_v17 = vld [vmem:[%s5655_s5 + $0x10] sm:$0xff]   ;;  %3905 = vmatpush3.bf16.msra.mxu1 %v4056_v11  ;;  %vm2976_vm2 = vcmask 1040384  }
 0x2fa   : > { %3845 = vmatprep.subr.bf16.mxu0 %v4119_v58  ;;  %3899 = vmatprep.subr.bf16.mxu1 %v4119_v58 }
 0x2fb   : > { %2287 = vrot.lane.b32.xlu0 %v2276_v46, %s4114_s23  ;;  %2419 = vrot.lane.b32.xlu1 %v2408_v16, %s4115_s26  ;;  %v2459_v46 = vrot.slane %v2457_v39, 2  ;;  %v2462_v16 = vrot.slane %v2460_v54, 3  ;;  %v2321_v39 = vshrl.u32 %v4885_v31, 16  ;;  %v2324_v54 = vshll.u32 %v4885_v31, 16 }
 0x2fd   : > { %v5040_v57 = vor.u32 %v2462_v16, %v2459_v46  ;;  %v2326_v46 = vrot.slane %v2324_v54, 2  ;;  %v2439_v16 = vrot.slane %v2191_v52, 2  ;;  %3846 = vmatpush3.bf16.msra.mxu0 %v4057_v17  ;;  %3906 = vmatpush3.bf16.msra.mxu1 %v4057_v17 }
 0x2fe   : > { %3847 = vmatprep.subr.bf16.mxu0 %v4119_v58  ;;  %3900 = vmatprep.subr.bf16.mxu1 %v4119_v58 }
 0x2ff   : > { %2392 = vrot.lane.b32.xlu0 %v2381_v26, %s4116_s13  ;;  %2500 = vrot.lane.b32.xlu1 %v2489_v29, %s4117_s15  ;;  %v2179_v26 = vshll.u32 %v4868_v62, 16  ;;  %v2183_v29 = vshrl.u32 %v4868_v62, 16  ;;  %v5053_v48 = vsel %vm2427_vm5, %v5038_v27, %v5040_v57 }
 0x301   : > { %v2435_v35 = vrot.slane %v2183_v29, 2  ;;  %v2436_v34 = vrot.slane %v2179_v26, 3  ;;  %v2181_v11 = vrot.slane %v2179_v26, 1  ;;  %3848 = vmatpush3.bf16.msra.mxu0 %v4058_v45  ;;  %3907 = vmatpush3.bf16.msra.mxu1 %v4058_v45 }
 0x302   : > { %3849 = vmatprep.subr.bf16.mxu0 %v4119_v58  ;;  %3901 = vmatprep.subr.bf16.mxu1 %v4119_v58 }
 0x303   : > { %2255 = vrot.lane.b32.xlu1 %v2244_v13, %s4113_s14  ;;  %2210 = vrot.lane.b32.xlu0 %v2166_v33, %s4118_s18  ;;  %v2301_v13 = vor.u32 %v2300_v47, %v2297_v18  ;;  %v2430_v33 = vor.u32 %v2429_v12, %v2428_v24  ;;  %v2382_v18 = vrot.slane %v4969_v9, 2  ;;  %v2173_v47 = vrot.slane %v2171_v22, 1 }
 0x304   : > { %v2169_v22 = vor.u32 %v2167_v53, %v4993_v55  ;;  %v2318_v53 = vor.u32 %v2317_v50, %v2314_v20  ;;  %v2437_v24 = vor.u32 %v2436_v34, %v2435_v35  ;;  %v2323_v12 = vrot.slane %v2321_v39, 1 }
 0x305   : > { %v2310_v40 = vsel %vm2293_vm4, %v2301_v13, %v5023_v10  ;;  %v2383_v31 = vsel %vm2370_vm1, %v2380_v49, %v2382_v18  ;;  %v2330_v49 = vshrl.u32 %v4916_v59, 16  ;;  %v2335_v20 = vrot.slane %v2333_v30, 2 }
 0x306   : > { %v2174_v55 = vsel %vm2154_vm3, %v2169_v22, %v2173_v47  ;;  %v2319_v41 = vsel %vm2293_vm4, %v5023_v10, %v2318_v53  ;;  %v2438_v13 = vsel %vm2427_vm5, %v5036_v32, %v2437_v24  ;;  %v2199_v50 = vshrl.u32 %v4941_v38, 16  ;;  %v4060_v22 = vld [vmem:[%s5655_s5 + $0x28] sm:$0xff]  }
 0x307   : > { %2289 = vrot.lane.b32.xlu1 %v2278_v36, %s4114_s23  ;;  %2421 = vrot.lane.b32.xlu0 %v2410_v42, %s4115_s26  ;;  %v2434_v36 = vsel %vm2427_vm5, %v2430_v33, %v5036_v32  ;;  %v2440_v42 = vrot.slane %v2187_v63, 3  ;;  %v2177_v33 = vor.u32 %v2175_v28, %v2173_v47  ;;  %v2332_v10 = vrot.slane %v2330_v49, 1 }
 0x308   : > { %v2195_v32 = vshll.u32 %v4941_v38, 16  ;;  %v2185_v47 = vor.u32 %v2183_v29, %v2181_v11  ;;  %v2189_v35 = vrot.slane %v2187_v63, 1  ;;  %v2203_v34 = vshll.u32 %v4967_v60, 16  ;;  %v4061_v29 = vld [vmem:[%s5655_s5 + $0x30] sm:$0x3f]  }
 0x309   : > { %v2441_v59 = vor.u32 %v2440_v42, %v2439_v16  ;;  %v2182_v28 = vsel %vm2154_vm3, %v2177_v33, %v2181_v11  ;;  %v2336_v54 = vor.u32 %v2335_v20, %v2332_v10  ;;  %v2339_v63 = vshrl.u32 %v4951_v44, 16 }
 0x30a   : > { %v2444_v17 = vrot.slane %v2195_v32, 3  ;;  %v2205_v16 = vrot.slane %v2203_v34, 1  ;;  %v2193_v10 = vor.u32 %v2191_v52, %v2189_v35  ;;  %v2207_v52 = vshrl.u32 %v4967_v60, 16 }
 0x30b   : > { %2356 = vrot.lane.b32.xlu1 %v2310_v40, %s4121_s28  ;;  %2465 = vrot.lane.b32.xlu0 %v2434_v36, %s4122_s12  ;;  %v2327_v40 = vor.u32 %v2326_v46, %v2323_v12  ;;  %v4059_v36 = vld [vmem:[%s5655_s5 + $0x20] sm:$0xff]   ;;  %v2442_v39 = vsel %vm2427_vm5, %v2437_v24, %v2441_v59  ;;  %v2190_v24 = vsel %vm2154_vm3, %v2185_v47, %v2189_v35  ;;  %v2197_v12 = vrot.slane %v2195_v32, 1 }
 0x30c   : > { %3850 = vmatpush3.bf16.msra.mxu0 %v4059_v36  ;;  %3908 = vmatpush3.bf16.msra.mxu1 %v4059_v36  ;;  %v2341_v45 = vrot.slane %v2339_v63, 1 }
 0x30d   : > { %v2328_v26 = vsel %vm2293_vm4, %v2318_v53, %v2327_v40  ;;  %3851 = vmatprep.subr.bf16.mxu0 %v4119_v58  ;;  %3902 = vmatprep.subr.bf16.mxu1 %v4119_v58  ;;  %v2351_v53 = vshll.u32 %v4969_v9, 16  ;;  %v2337_v46 = vsel %vm2293_vm4, %v2327_v40, %v2336_v54  ;;  %v2198_v32 = vsel %vm2154_vm3, %v2193_v10, %v2197_v12 }
 0x30f   : > { %2394 = vrot.lane.b32.xlu1 %v2383_v31, %s4116_s13  ;;  %2212 = vrot.lane.b32.xlu0 %v2174_v55, %s4118_s18  ;;  %v2342_v31 = vshll.u32 %v4951_v44, 16  ;;  %v2348_v55 = vshrl.u32 %v4969_v9, 16  ;;  %v2700_v44 = vsel %vm2370_vm1, %v4061_v29, 0  ;;  %vm3462_vm1 = vcmask 1041408  }
 0x310   : > { %3852 = vmatpush3.bf16.msra.mxu0 %v4060_v22  ;;  %3909 = vmatpush3.bf16.msra.mxu1 %v4060_v22 }
 0x311   : > { %3853 = vmatprep.subr.bf16.mxu0 %v4119_v58  ;;  %3903 = vmatprep.subr.bf16.mxu1 %v4119_v58  ;;  %v2344_v49 = vrot.slane %v2342_v31, 2  ;;  %v2350_v30 = vrot.slane %v2348_v55, 1 }
 0x313   : > { %2358 = vrot.lane.b32.xlu1 %v2319_v41, %s4121_s28  ;;  %2467 = vrot.lane.b32.xlu0 %v2438_v13, %s4122_s12  ;;  %v2353_v41 = vrot.slane %v2351_v53, 2  ;;  %v2201_v13 = vor.u32 %v2199_v50, %v2197_v12  ;;  %v2345_v40 = vor.u32 %v2344_v49, %v2341_v45 }
 0x314   : > { %3854 = vmatpush3.bf16.msra.mxu0 %v2700_v44  ;;  %3910 = vmatpush3.bf16.msra.mxu1 %v2700_v44 }
 0x315   : > { %v2206_v33 = vsel %vm2154_vm3, %v2201_v13, %v2205_v16  ;;  %v2354_v36 = vor.u32 %v2353_v41, %v2350_v30  ;;  %vm2977_vm3 = vcmask 1042434  }
 0x317   : > { %2423 = vrot.lane.b32.xlu1 %v4977_v37, %s4115_s26  ;;  %2214 = vrot.lane.b32.xlu0 %v2182_v28, %s4118_s18  ;;  %v2443_v37 = vrot.slane %v2199_v50, 2  ;;  %v2355_v20 = vsel %vm2293_vm4, %v2345_v40, %v2354_v36  ;;  %v2346_v50 = vsel %vm2293_vm4, %v2336_v54, %v2345_v40  ;;  %vm2978_vm4 = vmor %vm2976_vm2, %vm2977_vm3 }
 0x319   : > { %v2445_v42 = vor.u32 %v2444_v17, %v2443_v37 }
 0x31b   : > { %2360 = vrot.lane.b32.xlu1 %v2328_v26, %s4121_s28  ;;  %2469 = vrot.lane.b32.xlu0 %v2442_v39, %s4122_s12  ;;  %v2446_v11 = vsel %vm2427_vm5, %v2441_v59, %v2445_v42  ;;  %v2455_v59 = vsel %vm2427_vm5, %v2445_v42, %v5038_v27  ;;  %vm2979_vm5 = vcmask 1044484  }
 0x31f   : > { %2362 = vrot.lane.b32.xlu1 %v2337_v46, %s4121_s28  ;;  %2216 = vrot.lane.b32.xlu0 %v2190_v24, %s4118_s18 }
 0x323   : > { %2220 = vrot.lane.b32.xlu1 %v2206_v33, %s4118_s18  ;;  %2471 = vrot.lane.b32.xlu0 %v2446_v11, %s4122_s12 }
 0x327   : > { %2366 = vrot.lane.b32.xlu1 %v2355_v20, %s4121_s28  ;;  %2218 = vrot.lane.b32.xlu0 %v2198_v32, %s4118_s18 }
 0x32b   : > { %2475 = vrot.lane.b32.xlu1 %v5053_v48, %s4122_s12  ;;  %2364 = vrot.lane.b32.xlu0 %v2346_v50, %s4121_s28  ;;  %v2209_v48 = vor.u32 %v2207_v52, %v2205_v16 }
 0x32f   : > { %2504 = vrot.lane.b32.xlu1 %v5028_v21, %s4117_s15  ;;  %2473 = vrot.lane.b32.xlu0 %v2455_v59, %s4122_s12 }
 0x333   : > { %2257 = vrot.lane.b32.xlu1 %v2243_v61, %s4113_s14  ;;  %2502 = vrot.lane.b32.xlu0 %v5031_v14, %s4117_s15 }
 0x337   : > { %2368 = vrot.lane.b32.xlu1 %v2354_v36, %s4121_s28  ;;  %2222 = vrot.lane.b32.xlu0 %v2209_v48, %s4118_s18 }
 0x33b   : > { %2425 = vrot.lane.b32.xlu1 %v4965_v56, %s4115_s26  ;;  %2291 = vrot.lane.b32.xlu0 %v2277_v8, %s4114_s23 }
 0x33f   : > { %2506 = vrot.lane.b32.xlu1 %v2492_v43, %s4117_s15  ;;  %2396 = vrot.lane.b32.xlu0 %v2382_v18, %s4116_s13 }
 0x343   : > { %2477 = vrot.lane.b32.xlu0 %v5040_v57, %s4122_s12 }
 0x345   : > { %v2246_v61 = vpop.permute.xlu1 %2245 }
 0x349   : > { %v2280_v21 = vpop.permute.xlu0 %2279  ;;  %v2414_v14 = vpop.permute.xlu1 %2413 }
 0x34d   : > { %v2385_v27 = vpop.permute.xlu0 %2384  ;;  %v2495_v56 = vpop.permute.xlu1 %2494 }
 0x351   : > { %v2282_v28 = vpop.permute.xlu0 %2281  ;;  %v2248_v26 = vpop.permute.xlu1 %2247 }
 0x355   : > { %v2387_v47 = vpop.permute.xlu0 %2386  ;;  %v2416_v8 = vpop.permute.xlu1 %2415 }
 0x359   : > { %v2284_v35 = vpop.permute.xlu0 %2283  ;;  %v2497_v34 = vpop.permute.xlu1 %2496 }
 0x35d   : > { %v2389_v15 = vpop.permute.xlu0 %2388  ;;  %v2250_v43 = vpop.permute.xlu1 %2249 }
 0x361   : > { %v5185_v22 = vpop.permute.xlu0 %2285  ;;  %v2418_v9 = vpop.permute.xlu1 %2417 }
 0x365   : > { %v5187_v18 = vpop.permute.xlu0 %2390  ;;  %v2499_v39 = vpop.permute.xlu1 %2498 }
 0x369   : > { %v5189_v57 = vpop.permute.xlu0 %2253  ;;  %v2252_v54 = vpop.permute.xlu1 %2251 }
 0x36d   : > { %v5191_v37 = vpop.permute.xlu0 %2287  ;;  %v5193_v17 = vpop.permute.xlu1 %2419 }
 0x371   : > { %v5195_v29 = vpop.permute.xlu0 %2392  ;;  %v5197_v63 = vpop.permute.xlu1 %2500 }
 0x375   : > { %v5199_v31 = vpop.permute.xlu1 %2255  ;;  %v2211_v55 = vpop.permute.xlu0 %2210 }
 0x376   : > { %v2510_v53 = vsel %vm2508_vm7, %v4817_v25, %v2211_v55 }
 0x377   : > { %v2525_v46 = vsel %vm2523_vm8, %v2510_v53, %v2246_v61 }
 0x378   : > { %v2540_v42 = vsel %vm2538_vm9, %v2525_v46, %v2280_v21 }
 0x379   : > { %v2290_v24 = vpop.permute.xlu1 %2289  ;;  %v5203_v12 = vpop.permute.xlu0 %2421 }
 0x37d   : > { %v2357_v16 = vpop.permute.xlu1 %2356  ;;  %v2466_v44 = vpop.permute.xlu0 %2465 }
 0x37e   : > { %v2555_v45 = vsel %vm2553_vm10, %v2540_v42, %v2357_v16 }
 0x37f   : > { %v2570_v49 = vsel %vm2568_vm11, %v2555_v45, %v2385_v27 }
 0x380   : > { %v2585_v25 = vsel %vm2583_vm12, %v2570_v49, %v2414_v14 }
 0x381   : > { %v2600_v30 = vsel %vm2598_vm13, %v2585_v25, %v2466_v44  ;;  %v2395_v41 = vpop.permute.xlu1 %2394  ;;  %v2213_v13 = vpop.permute.xlu0 %2212 }
 0x382   : > { %v2512_v33 = vsel %vm2508_vm7, %v4813_v19, %v2213_v13  ;;  %v2615_v11 = vsel %vm2613_vm15, %v2600_v30, %v2495_v56 }
 0x383   : > { %v2527_v40 = vsel %vm2523_vm8, %v2512_v33, %v2248_v26  ;;  %3856 = vmatmul.mubr.msk.bf16.vlgmr.msra.gmra.mrb[0].mxu0 %vm2683_vm0, %v2615_v11 }
 0x384   : > { %v2542_v36 = vsel %vm2538_vm9, %v2527_v40, %v2282_v28  ;;  %3859 = vmatprep.mubr.msk.bf16.mxu0 %vm4120_vm6, %v4119_v58 }
 0x385   : > { %v2359_v10 = vpop.permute.xlu1 %2358  ;;  %v2468_v20 = vpop.permute.xlu0 %2467 }
 0x386   : > { %v2557_v32 = vsel %vm2553_vm10, %v2542_v36, %v2359_v10 }
 0x387   : > { %v2572_v50 = vsel %vm2568_vm11, %v2557_v32, %v2387_v47 }
 0x388   : > { %v2587_v59 = vsel %vm2583_vm12, %v2572_v50, %v2416_v8 }
 0x389   : > { %v2602_v19 = vsel %vm2598_vm13, %v2587_v59, %v2468_v20  ;;  %v2424_v52 = vpop.permute.xlu1 %2423  ;;  %v2215_v48 = vpop.permute.xlu0 %2214 }
 0x38a   : > { %v2514_v61 = vsel %vm2508_vm7, %v4832_v51, %v2215_v48  ;;  %v2617_v21 = vsel %vm2613_vm15, %v2602_v19, %v2497_v34 }
 0x38b   : > { %v2529_v14 = vsel %vm2523_vm8, %v2514_v61, %v2250_v43  ;;  %3860 = vmatmul.mubr.msk.bf16.gmra.mrb[4].mxu0 %vm2683_vm0, %v2617_v21 }
 0x38c   : > { %v2544_v27 = vsel %vm2538_vm9, %v2529_v14, %v2284_v35  ;;  %3863 = vmatprep.mubr.msk.bf16.mxu0 %vm4120_vm6, %v4119_v58 }
 0x38d   : > { %v2361_v56 = vpop.permute.xlu1 %2360  ;;  %v2470_v28 = vpop.permute.xlu0 %2469 }
 0x38e   : > { %v2559_v26 = vsel %vm2553_vm10, %v2544_v27, %v2361_v56 }
 0x38f   : > { %v2574_v47 = vsel %vm2568_vm11, %v2559_v26, %v2389_v15 }
 0x390   : > { %v2589_v8 = vsel %vm2583_vm12, %v2574_v47, %v2418_v9 }
 0x391   : > { %v2604_v51 = vsel %vm2598_vm13, %v2589_v8, %v2470_v28  ;;  %v2363_v34 = vpop.permute.xlu1 %2362  ;;  %v2217_v55 = vpop.permute.xlu0 %2216  ;;  %v4123_v8 = vmov 1983009808  }
 0x392   : > { %v2516_v43 = vsel %vm2508_vm7, %v4868_v62, %v2217_v55  ;;  %v2619_v35 = vsel %vm2613_vm15, %v2604_v51, %v2499_v39  ;;  %v2801_v51 = vunpack.c.l.s4 %v4123_v8 }
 0x393   : > { %v2531_v53 = vsel %vm2523_vm8, %v2516_v43, %v2252_v54  ;;  %3864 = vmatmul.mubr.msk.bf16.gmra.mrb[8].mxu0 %vm2683_vm0, %v2619_v35 }
 0x394   : > { %v2546_v46 = vsel %vm2538_vm9, %v2531_v53, %v5185_v22  ;;  %3867 = vmatprep.mubr.msk.bf16.mxu0 %vm4120_vm6, %v4119_v58  ;;  %v2802_v55 = vunpack.c.0.s8 %v2801_v51 }
 0x395   : > { %v2221_v15 = vpop.permute.xlu1 %2220  ;;  %v2561_v9 = vsel %vm2553_vm10, %v2546_v46, %v2363_v34  ;;  %v2472_v16 = vpop.permute.xlu0 %2471  ;;  %v2803_v34 = vlaneseq }
 0x396   : > { %v2520_v42 = vsel %vm2508_vm7, %v4941_v38, %v2221_v15  ;;  %v2576_v62 = vsel %vm2568_vm11, %v2561_v9, %v5187_v18  ;;  %v3782_v15 = vld [vmem:[%s5656_s6] ss:$0 sm:$0xff] }
 0x397   : > { %v2535_v39 = vsel %vm2523_vm8, %v2520_v42, %v5199_v31  ;;  %v2591_v54 = vsel %vm2583_vm12, %v2576_v62, %v5193_v17  ;;  %v2804_v43 = vshrl.u32 %v2803_v34, 7  ;;  %v3783_v9 = vld [vmem:[%s5657_s7] ss:$0 sm:$0xff]  ;;  %v3125_v42 = vcombine.high %v3782_v15, %v3782_v15 }
 0x398   : > { %v2606_v22 = vsel %vm2598_vm13, %v2591_v54, %v2472_v16  ;;  %v2550_v44 = vsel %vm2538_vm9, %v2535_v39, %v2290_v24  ;;  %v3184_v62 = vcombine.high %v3783_v9, %v3783_v9 }
 0x399   : > { %v2367_v45 = vpop.permute.xlu1 %2366  ;;  %v2219_v49 = vpop.permute.xlu0 %2218  ;;  %v2621_v25 = vsel %vm2613_vm15, %v2606_v22, %v5197_v63  ;;  %v5295_v35 = vsub.s32 %v2802_v55, %v2804_v43 }
 0x39a   : > { %v2565_v38 = vsel %vm2553_vm10, %v2550_v44, %v2367_v45  ;;  %v2518_v18 = vsel %vm2508_vm7, %v4912_v23, %v2219_v49 }
 0x39b   : > { %v2580_v30 = vsel %vm2568_vm11, %v2565_v38, %v2395_v41  ;;  %v2533_v31 = vsel %vm2523_vm8, %v2518_v18, %v5189_v57  ;;  %3868 = vmatmul.mubr.msk.bf16.gmra.mrb[12].mxu0 %vm2683_vm0, %v2621_v25  ;;  %v5305_v44 = vrot.slane %v3782_v15, %v5295_v35  ;;  %v5308_v45 = vrot.slane %v3783_v9, %v5295_v35 }
 0x39c   : > { %v2548_v17 = vsel %vm2538_vm9, %v2533_v31, %v5191_v37  ;;  %3871 = vmatprep.mubr.msk.bf16.mxu0 %vm4120_vm6, %v4119_v58  ;;  %v2595_v13 = vsel %vm2583_vm12, %v2580_v30, %v2424_v52  ;;  %v5316_v18 = vrot.slane %v3125_v42, %v5295_v35  ;;  %v5319_v30 = vrot.slane %v3184_v62, %v5295_v35 }
 0x39d   : > { %v2476_v24 = vpop.permute.xlu1 %2475  ;;  %v2365_v63 = vpop.permute.xlu0 %2364 }
 0x39e   : > { %v2563_v33 = vsel %vm2553_vm10, %v2548_v17, %v2365_v63  ;;  %v2610_v41 = vsel %vm2598_vm13, %v2595_v13, %v2476_v24  ;;  %v5323_v63 = vcombine.high %v5305_v44, %v5305_v44  ;;  %v5327_v13 = vcombine.high %v5308_v45, %v5308_v45 }
 0x39f   : > { %v2578_v23 = vsel %vm2568_vm11, %v2563_v33, %v5195_v29 }
 0x3a0   : > { %v2593_v37 = vsel %vm2583_vm12, %v2578_v23, %v5203_v12 }
 0x3a1   : > { %v2505_v57 = vpop.permute.xlu1 %2504  ;;  %v2474_v11 = vpop.permute.xlu0 %2473 }
 0x3a2   : > { %v2625_v40 = vsel %vm2613_vm15, %v2610_v41, %v2505_v57  ;;  %v2608_v36 = vsel %vm2598_vm13, %v2593_v37, %v2474_v11 }
 0x3a3   : > { %3876 = vmatmul.mubr.msk.bf16.vlgmr.msra.gmra.mrb[0].mxu1 %vm2683_vm0, %v2625_v40 }
 0x3a4   : > { %3879 = vmatprep.mubr.msk.bf16.mxu1 %vm4120_vm6, %v4119_v58  ;;  %vm2980_vm6 = vmor %vm2978_vm4, %vm2979_vm5 }
 0x3a5   : > { %v2258_v10 = vpop.permute.xlu1 %2257  ;;  %v2503_v20 = vpop.permute.xlu0 %2502 }
 0x3a6   : > { %v2623_v29 = vsel %vm2613_vm15, %v2608_v36, %v2503_v20  ;;  %v5339_v20 = vcombine.high %v5319_v30, %v5319_v30 }
 0x3a7   : > { %3872 = vmatmul.mubr.msk.bf16.gmra.mrb[16].mxu0 %vm2683_vm0, %v2623_v29 }
 0x3a9   : > { %v2223_v32 = vpop.permute.xlu0 %2222  ;;  %v2369_v50 = vpop.permute.xlu1 %2368 }
 0x3aa   : > { %v2522_v59 = vsel %vm2508_vm7, %v4967_v60, %v2223_v32  ;;  %v3449_v60 = vld [vmem:[%s5658_s8] sm:$0x3]  ;;  %vm2981_vm7 = vcmask 1046534  }
 0x3ab   : > { %v2537_v12 = vsel %vm2523_vm8, %v2522_v59, %v2258_v10  ;;  %3911 = vmatprep.subr.msk.bf16.mxu1 %vm3462_vm1, %v3449_v60  ;;  %v3464_v47 = vsel %vm3462_vm1, %v3449_v60, 0  ;;  %vm5311_vm8 = vmor %vm2980_vm6, %vm2981_vm7  ;;  %v5335_v10 = vcombine.high %v5316_v18, %v5316_v18 }
 0x3ac   : > { %3884 = vmatpush3.bf16.msra.mxu1 %v3464_v47 }
 0x3ad   : > { %v2292_v19 = vpop.permute.xlu0 %2291  ;;  %v2426_v48 = vpop.permute.xlu1 %2425 }
 0x3ae   : > { %v2552_v52 = vsel %vm2538_vm9, %v2537_v12, %v2292_v19 }
 0x3af   : > { %v2567_v58 = vsel %vm2553_vm10, %v2552_v52, %v2369_v50 }
 0x3b1   : > { %v2397_v61 = vpop.permute.xlu0 %2396  ;;  %v2507_v56 = vpop.permute.xlu1 %2506 }
 0x3b2   : > { %v2582_v21 = vsel %vm2568_vm11, %v2567_v58, %v2397_v61 }
 0x3b3   : > { %v2597_v14 = vsel %vm2583_vm12, %v2582_v21, %v2426_v48 }
 0x3b5   : > { %v2478_v27 = vpop.permute.xlu0 %2477 }
 0x3b6   : > { %v2612_v28 = vsel %vm2598_vm13, %v2597_v14, %v2478_v27 }
 0x3b7   : > { %v2627_v26 = vsel %vm2613_vm15, %v2612_v28, %v2507_v56 }
 0x3b8   : > { %3880 = vmatmul.mubr.msk.bf16.gmra.mrb[4].mxu1 %vm2683_vm0, %v2627_v26 }
 0x456   : > { %v2736_v53 = vpop.f32.mrb[0].mxu0 }
 0x457   : > { %v3857_v46 = vpop.f32.mrb[1].mxu0 }
 0x458   : > { %v2738_v16 = vpop.f32.mrb[2].mxu0 }
 0x459   : > { %v2799_v39 = vcombine.high %v2738_v16, %v2738_v16  ;;  %v2806_v54 = vrot.slane %v2738_v16, %v5295_v35  ;;  %v3858_v22 = vpop.f32.mrb[3].mxu0 }
 0x45b   : > { %v2813_v49 = vrot.slane %v2799_v39, %v5295_v35  ;;  %v2814_v25 = vcombine.high %v2806_v54, %v2806_v54 }
 0x45d   : > { %v2815_v31 = vcombine.high %v2813_v49, %v2813_v49  ;;  %v3774_v17 = vrot.slane %v2814_v25, 9  ;;  %v2985_v24 = vrot.slane %v2813_v49, 7 }
 0x45e   : > { %v2743_v33 = vpop.f32.mrb[4].mxu0 }
 0x45f   : > { %v2986_v23 = vsel %vm5311_vm8, %v3774_v17, %v2985_v24  ;;  %v2987_v41 = vrot.slane %v2985_v24, 2  ;;  %v2988_v57 = vrot.slane %v2815_v31, 7  ;;  %v2816_v11 = vcombine.high %v2743_v33, %v2743_v33  ;;  %v3861_v40 = vpop.f32.mrb[5].mxu0 }
 0x460   : > { %v3146_v37 = vmul.f32 %v5305_v44, %v2986_v23  ;;  %v2823_v36 = vrot.slane %v2743_v33, %v5295_v35  ;;  %v2746_v29 = vpop.f32.mrb[6].mxu0 }
 0x461   : > { %v2989_v32 = vsel %vm5311_vm8, %v2987_v41, %v2988_v57  ;;  %v2990_v50 = vrot.slane %v2988_v57, 2  ;;  %v2830_v59 = vrot.slane %v2816_v11, %v5295_v35  ;;  %v2833_v12 = vcombine.high %v2746_v29, %v2746_v29  ;;  %v3862_v19 = vpop.f32.mrb[7].mxu0 }
 0x462   : > { %v3147_v52 = vmul.f32 %v5323_v63, %v2989_v32  ;;  %v3205_v48 = vadd.f32 %v5308_v45, %v3146_v37  ;;  %v2831_v58 = vcombine.high %v2823_v36, %v2823_v36  ;;  %v2991_v61 = vrot.slane %v2823_v36, 7 }
 0x463   : > { %v2832_v21 = vcombine.high %v2830_v59, %v2830_v59  ;;  %v3775_v14 = vrot.slane %v2830_v59, 9  ;;  %v2840_v27 = vrot.slane %v2746_v29, %v5295_v35  ;;  %v2847_v56 = vrot.slane %v2833_v12, %v5295_v35 }
 0x464   : > { %v3206_v28 = vadd.f32 %v5327_v13, %v3147_v52  ;;  %v3237_v26 = vmax.f32 %v3205_v48, 0.0  ;;  %v2992_v60 = vsel %vm5311_vm8, %v2990_v50, %v2991_v61  ;;  %v2993_v47 = vrot.slane %v2991_v61, 2 }
 0x465   : > { %v2994_v8 = vrot.slane %v2831_v58, 7  ;;  %v2998_v51 = vrot.slane %v2832_v21, 7  ;;  %v3148_v34 = vmul.f32 %v5316_v18, %v2992_v60  ;;  %v2848_v55 = vcombine.high %v2840_v27, %v2840_v27 }
 0x466   : > { %v3238_v43 = vmax.f32 %v3206_v28, 0.0  ;;  %v2849_v53 = vcombine.high %v2847_v56, %v2847_v56  ;;  %v3001_v46 = vrot.slane %v2840_v27, 7  ;;  %v3007_v15 = vrot.slane %v2847_v56, 7  ;;  %v2751_v9 = vpop.f32.mrb[8].mxu0 }
 0x467   : > { %v2995_v16 = vsel %vm5311_vm8, %v2993_v47, %v2994_v8  ;;  %v2999_v42 = vsel %vm5311_vm8, %v3775_v14, %v2998_v51  ;;  %v3000_v62 = vrot.slane %v2998_v51, 2  ;;  %v5357_v39 = vadd.f32 %v5319_v30, %v3148_v34  ;;  %v3865_v54 = vpop.f32.mrb[9].mxu0 }
 0x468   : > { %v5359_v22 = vcombine.low %v3237_v26, %v3238_v43  ;;  %v3149_v49 = vmul.f32 %v5335_v10, %v2995_v16  ;;  %v3150_v25 = vmul.f32 %v5305_v44, %v2999_v42  ;;  %v3003_v31 = vrot.slane %v3001_v46, 2  ;;  %v2754_v17 = vpop.f32.mrb[10].mxu0 }
 0x469   : > { %v3239_v24 = vmax.f32 %v5357_v39, 0.0  ;;  %v3002_v33 = vsel %vm5311_vm8, %v3000_v62, %v3001_v46  ;;  %v3004_v23 = vrot.slane %v2848_v55, 7  ;;  %v3776_v41 = vrot.slane %v2849_v53, 9  ;;  %v3866_v57 = vpop.f32.mrb[11].mxu0 }
 0x46a   : > { %v5367_v11 = vadd.f32 %v5339_v20, %v3149_v49  ;;  %v5370_v40 = vadd.f32 %v5308_v45, %v3150_v25  ;;  %v3151_v37 = vmul.f32 %v5323_v63, %v3002_v33  ;;  %v2850_v36 = vcombine.high %v2751_v9, %v2751_v9 }
 0x46b   : > { %v3005_v29 = vsel %vm5311_vm8, %v3003_v31, %v3004_v23  ;;  %v3006_v32 = vrot.slane %v3004_v23, 2  ;;  %v2857_v50 = vrot.slane %v2751_v9, %v5295_v35  ;;  %v2867_v59 = vcombine.high %v2754_v17, %v2754_v17 }
 0x46c   : > { %v3240_v12 = vmax.f32 %v5367_v11, 0.0  ;;  %v3241_v19 = vmax.f32 %v5370_v40, 0.0  ;;  %v3152_v52 = vmul.f32 %v5316_v18, %v3005_v29  ;;  %v5380_v48 = vadd.f32 %v5327_v13, %v3151_v37 }
 0x46d   : > { %v3008_v58 = vsel %vm5311_vm8, %v3006_v32, %v3007_v15  ;;  %v2864_v61 = vrot.slane %v2850_v36, %v5295_v35  ;;  %v2865_v21 = vcombine.high %v2857_v50, %v2857_v50  ;;  %v3011_v14 = vrot.slane %v2857_v50, 7 }
 0x46e   : > { %v3153_v27 = vmul.f32 %v5335_v10, %v3008_v58  ;;  %v5387_v56 = vadd.f32 %v5319_v30, %v3152_v52  ;;  %v3242_v28 = vmax.f32 %v5380_v48, 0.0  ;;  %v2874_v26 = vrot.slane %v2754_v17, %v5295_v35  ;;  %v2759_v60 = vpop.f32.mrb[12].mxu0 }
 0x46f   : > { %v2866_v47 = vcombine.high %v2864_v61, %v2864_v61  ;;  %v3012_v8 = vsel %vm5311_vm8, %v3776_v41, %v3011_v14  ;;  %v3013_v51 = vrot.slane %v3011_v14, 2  ;;  %v3014_v34 = vrot.slane %v2865_v21, 7  ;;  %v3869_v55 = vpop.f32.mrb[13].mxu0 }
 0x470   : > { %v5394_v43 = vadd.f32 %v5339_v20, %v3153_v27  ;;  %v3243_v53 = vmax.f32 %v5387_v56, 0.0  ;;  %v3017_v46 = vrot.slane %v2864_v61, 7  ;;  %v3154_v15 = vmul.f32 %v5305_v44, %v3012_v8  ;;  %v5398_v9 = vpop.f32.mrb[14].mxu0 }
 0x471   : > { %v3015_v16 = vsel %vm5311_vm8, %v3013_v51, %v3014_v34  ;;  %v3016_v42 = vrot.slane %v3014_v34, 2  ;;  %v3020_v62 = vrot.slane %v2866_v47, 7  ;;  %v2881_v54 = vrot.slane %v2867_v59, %v5295_v35  ;;  %v3870_v49 = vpop.f32.mrb[15].mxu0 }
 0x472   : > { %v3244_v25 = vmax.f32 %v5394_v43, 0.0  ;;  %v3019_v31 = vrot.slane %v3017_v46, 2  ;;  %v3155_v17 = vmul.f32 %v5323_v63, %v3015_v16  ;;  %v3213_v33 = vadd.f32 %v5308_v45, %v3154_v15 }
 0x473   : > { %v3018_v23 = vsel %vm5311_vm8, %v3016_v42, %v3017_v46  ;;  %v2882_v41 = vcombine.high %v2874_v26, %v2874_v26  ;;  %v2883_v57 = vcombine.high %v2881_v54, %v2881_v54  ;;  %v3777_v37 = vrot.slane %v2874_v26, 9 }
 0x474   : > { %v3021_v36 = vsel %vm5311_vm8, %v3019_v31, %v3020_v62  ;;  %v3156_v29 = vmul.f32 %v5316_v18, %v3018_v23  ;;  %v3214_v32 = vadd.f32 %v5327_v13, %v3155_v17  ;;  %v3245_v50 = vmax.f32 %v3213_v33, 0.0 }
 0x475   : > { %v3157_v59 = vmul.f32 %v5335_v10, %v3021_v36  ;;  %v3024_v52 = vrot.slane %v2882_v41, 7  ;;  %v3027_v58 = vrot.slane %v2881_v54, 7  ;;  %v3030_v61 = vrot.slane %v2883_v57, 7 }
 0x476   : > { %v3215_v21 = vadd.f32 %v5319_v30, %v3156_v29  ;;  %v3246_v14 = vmax.f32 %v3214_v32, 0.0  ;;  %v2884_v27 = vcombine.high %v2759_v60, %v2759_v60  ;;  %v2891_v47 = vrot.slane %v2759_v60, %v5295_v35  ;;  %v5415_v26 = vpop.f32.mrb[0].mxu1 }
 0x477   : > { %v3216_v8 = vadd.f32 %v5339_v20, %v3157_v59  ;;  %v3025_v51 = vsel %vm5311_vm8, %v3777_v37, %v3024_v52  ;;  %v3026_v34 = vrot.slane %v3024_v52, 2  ;;  %v3029_v55 = vrot.slane %v3027_v58, 2  ;;  %v3877_v46 = vpop.f32.mrb[1].mxu1 }
 0x478   : > { %v3247_v15 = vmax.f32 %v3215_v21, 0.0  ;;  %v3335_v16 = vcombine.low %v3245_v50, %v3246_v14  ;;  %v3032_v42 = vrot.slane %v3030_v61, 2  ;;  %v3158_v62 = vmul.f32 %v5305_v44, %v3025_v51  ;;  %v5421_v54 = vpop.f32.mrb[2].mxu1 }
 0x479   : > { %v3248_v49 = vmax.f32 %v3216_v8, 0.0  ;;  %v3028_v60 = vsel %vm5311_vm8, %v3026_v34, %v3027_v58  ;;  %v3031_v31 = vsel %vm5311_vm8, %v3029_v55, %v3030_v61  ;;  %v2898_v17 = vrot.slane %v2884_v27, %v5295_v35  ;;  %v3878_v33 = vpop.f32.mrb[3].mxu1 }
 0x47a   : > { %v3343_v23 = vrot.slane %v3335_v16, %v5295_v35  ;;  %v3159_v41 = vmul.f32 %v5323_v63, %v3028_v60  ;;  %v3160_v57 = vmul.f32 %v5316_v18, %v3031_v31  ;;  %v3217_v37 = vadd.f32 %v5308_v45, %v3158_v62  ;;  %v5432_v36 = vpop.f32.mrb[16].mxu0 }
 0x47b   : > { %v3336_v29 = vcombine.low %v3247_v15, %v3248_v49  ;;  %v2899_v32 = vcombine.high %v2891_v47, %v2891_v47  ;;  %v2900_v50 = vcombine.high %v2898_v17, %v2898_v17  ;;  %v3033_v59 = vrot.slane %v2891_v47, 7  ;;  %v3873_v52 = vpop.f32.mrb[17].mxu0 }
 0x47c   : > { %v3218_v58 = vadd.f32 %v5327_v13, %v3159_v41  ;;  %v3219_v61 = vadd.f32 %v5319_v30, %v3160_v57  ;;  %v3249_v21 = vmax.f32 %v3217_v37, 0.0  ;;  %v3037_v14 = vrot.slane %v2898_v17, 7  ;;  %v5436_v27 = vpop.f32.mrb[18].mxu0 }
 0x47d   : > { %v3350_v8 = vrot.slane %v3336_v29, %v5295_v35  ;;  %v3034_v51 = vsel %vm5311_vm8, %v3032_v42, %v3033_v59  ;;  %v3778_v34 = vrot.slane %v2899_v32, 9  ;;  %v3040_v55 = vrot.slane %v2900_v50, 7  ;;  %v3874_v46 = vpop.f32.mrb[19].mxu0 }
 0x47e   : > { %v3250_v15 = vmax.f32 %v3218_v58, 0.0  ;;  %v3251_v16 = vmax.f32 %v3219_v61, 0.0  ;;  %v3039_v47 = vrot.slane %v3037_v14, 2  ;;  %v3161_v62 = vmul.f32 %v5335_v10, %v3034_v51 }
 0x47f   : > { %v5442_v49 = vcombine.low %v3343_v23, %v3350_v8  ;;  %v3038_v60 = vsel %vm5311_vm8, %v3778_v34, %v3037_v14  ;;  %v3042_v31 = vrot.slane %v3040_v55, 2  ;;  %v2901_v17 = vcombine.high %v5398_v9, %v5398_v9 }
 0x480   : > { %v3352_v33 = vcombine.low %v3249_v21, %v3250_v15  ;;  %v3041_v42 = vsel %vm5311_vm8, %v3039_v47, %v3040_v55  ;;  %v3162_v41 = vmul.f32 %v5305_v44, %v3038_v60  ;;  %v3220_v57 = vadd.f32 %v5339_v20, %v3161_v62 }
 0x481   : > { %v3163_v37 = vmul.f32 %v5323_v63, %v3041_v42  ;;  %v2908_v23 = vrot.slane %v5398_v9, %v5295_v35  ;;  %v2915_v29 = vrot.slane %v2901_v17, %v5295_v35  ;;  %v2952_v32 = vcombine.high %v5415_v26, %v5415_v26 }
 0x482   : > { %v3360_v50 = vrot.slane %v3352_v33, %v5295_v35  ;;  %v5460_v59 = vadd.f32 %v5308_v45, %v3162_v41  ;;  %v3252_v52 = vmax.f32 %v3220_v57, 0.0  ;;  %v2959_v58 = vrot.slane %v5415_v26, %v5295_v35 }
 0x483   : > { %v5465_v61 = vadd.f32 %v5327_v13, %v3163_v37  ;;  %v2916_v21 = vcombine.high %v2908_v23, %v2908_v23  ;;  %v2917_v14 = vcombine.high %v2915_v29, %v2915_v29  ;;  %v3043_v9 = vrot.slane %v2908_v23, 7 }
 0x484   : > { %v3253_v8 = vmax.f32 %v5460_v59, 0.0  ;;  %v3353_v51 = vcombine.low %v3251_v16, %v3252_v52  ;;  %v3779_v34 = vrot.slane %v2915_v29, 9  ;;  %v2966_v55 = vrot.slane %v2952_v32, %v5295_v35 }
 0x485   : > { %v3254_v46 = vmax.f32 %v5465_v61, 0.0  ;;  %v3044_v15 = vsel %vm5311_vm8, %v3042_v31, %v3043_v9  ;;  %v3045_v47 = vrot.slane %v3043_v9, 2  ;;  %v3046_v62 = vrot.slane %v2916_v21, 7 }
 0x486   : > { %v3367_v26 = vrot.slane %v3353_v51, %v5295_v35  ;;  %v5473_v60 = vrot.slane %v2917_v14, 7  ;;  %v3164_v17 = vmul.f32 %v5316_v18, %v3044_v15  ;;  %v2967_v33 = vcombine.high %v2959_v58, %v2959_v58 }
 0x487   : > { %v3047_v16 = vsel %vm5311_vm8, %v3045_v47, %v3046_v62  ;;  %v2968_v42 = vcombine.high %v2966_v55, %v2966_v55  ;;  %v3781_v41 = vrot.slane %v2959_v58, 9  ;;  %v3079_v57 = vrot.slane %v2966_v55, 7 }
 0x488   : > { %v5478_v37 = vcombine.low %v3360_v50, %v3367_v26  ;;  %v3051_v31 = vsel %vm5311_vm8, %v3779_v34, %v5473_v60  ;;  %v3052_v23 = vrot.slane %v5473_v60, 2  ;;  %v3165_v29 = vmul.f32 %v5335_v10, %v3047_v16 }
 0x489   : > { %v3166_v32 = vmul.f32 %v5305_v44, %v3051_v31  ;;  %v5487_v52 = vadd.f32 %v5319_v30, %v3164_v17  ;;  %v3076_v21 = vrot.slane %v2967_v33, 7  ;;  %v3081_v14 = vrot.slane %v3079_v57, 2 }
 0x48a   : > { %v5490_v58 = vadd.f32 %v5339_v20, %v3165_v29  ;;  %v3082_v50 = vrot.slane %v2968_v42, 7  ;;  %v2975_v9 = vrot.slane %v5421_v54, %v5295_v35  ;;  %v3302_v51 = vcombine.low %v3239_v24, %v3240_v12 }
 0x48b   : > { %v5499_v34 = vadd.f32 %v5308_v45, %v3166_v32  ;;  %v3255_v55 = vmax.f32 %v5487_v52, 0.0  ;;  %v3077_v15 = vsel %vm5311_vm8, %v3781_v41, %v3076_v21  ;;  %v3078_v47 = vrot.slane %v3076_v21, 2  ;;  %v2783_v62 = vpop.f32.mrb[4].mxu1 }
 0x48c   : > { %v3256_v26 = vmax.f32 %v5490_v58, 0.0  ;;  %v3083_v54 = vsel %vm5311_vm8, %v3081_v14, %v3082_v50  ;;  %v3084_v60 = vrot.slane %v3082_v50, 2  ;;  %v3174_v11 = vmul.f32 %v5305_v44, %v3077_v15  ;;  %v3881_v39 = vpop.f32.mrb[5].mxu1 }
 0x48d   : > { %v3257_v24 = vmax.f32 %v5499_v34, 0.0  ;;  %v3080_v12 = vsel %vm5311_vm8, %v3078_v47, %v3079_v57  ;;  %v3176_v17 = vmul.f32 %v5316_v18, %v3083_v54  ;;  %v3085_v33 = vrot.slane %v2975_v9, 7  ;;  %v2785_v16 = vpop.f32.mrb[6].mxu1 }
 0x48e   : > { %v3175_v42 = vmul.f32 %v5323_v63, %v3080_v12  ;;  %v5514_v41 = vadd.f32 %v5308_v45, %v3174_v11  ;;  %v3309_v31 = vrot.slane %v5359_v22, %v5295_v35  ;;  %v3316_v29 = vrot.slane %v3302_v51, %v5295_v35  ;;  %v3882_v32 = vpop.f32.mrb[7].mxu1 }
 0x48f   : > { %v3086_v21 = vsel %vm5311_vm8, %v3084_v60, %v3085_v33  ;;  %v3235_v57 = vadd.f32 %v5319_v30, %v3176_v17  ;;  %v3318_v14 = vcombine.low %v3241_v19, %v3242_v28  ;;  %v3319_v50 = vcombine.low %v3243_v53, %v3244_v25 }
 0x490   : > { %v5531_v22 = vadd.f32 %v5327_v13, %v3175_v42  ;;  %v3265_v9 = vmax.f32 %v5514_v41, 0.0  ;;  %v3177_v51 = vmul.f32 %v5335_v10, %v3086_v21  ;;  %v3317_v15 = vcombine.low %v3309_v31, %v3316_v29 }
 0x491   : > { %v3267_v47 = vmax.f32 %v3235_v57, 0.0  ;;  %v3326_v62 = vrot.slane %v3318_v14, %v5295_v35  ;;  %v3333_v48 = vrot.slane %v3319_v50, %v5295_v35  ;;  %v2918_v40 = vcombine.high %v5432_v36, %v5432_v36 }
 0x492   : > { %v3266_v19 = vmax.f32 %v5531_v22, 0.0  ;;  %v3236_v56 = vadd.f32 %v5339_v20, %v3177_v51  ;;  %v2925_v28 = vrot.slane %v5432_v36, %v5295_v35  ;;  %v2935_v43 = vcombine.high %v5436_v27, %v5436_v27 }
 0x493   : > { %v3334_v53 = vcombine.low %v3326_v62, %v3333_v48  ;;  %v2932_v25 = vrot.slane %v2918_v40, %v5295_v35  ;;  %v2942_v54 = vrot.slane %v5436_v27, %v5295_v35  ;;  %v3446_v60 = vpack.c.bf16 %v5478_v37, %v5442_v49 }
 0x494   : > { %v3268_v11 = vmax.f32 %v3236_v56, 0.0  ;;  %v2933_v39 = vcombine.high %v2925_v28, %v2925_v28  ;;  %v3053_v12 = vrot.slane %v2925_v28, 7  ;;  %v2949_v17 = vrot.slane %v2935_v43, %v5295_v35 }
 0x495   : > { %v3445_v33 = vpack.c.bf16 %v3334_v53, %v3317_v15  ;;  %v2934_v16 = vcombine.high %v2932_v25, %v2932_v25  ;;  %v3059_v36 = vrot.slane %v2932_v25, 7  ;;  %v2950_v42 = vcombine.high %v2942_v54, %v2942_v54 }
 0x496   : > { %v3421_v31 = vcombine.low %v3267_v47, %v3268_v11  ;;  %v3054_v29 = vsel %vm5311_vm8, %v3052_v23, %v3053_v12  ;;  %v3055_v32 = vrot.slane %v3053_v12, 2  ;;  %v3056_v21 = vrot.slane %v2933_v39, 7 }
 0x497   : > { %3885 = vmatprep.mubr.msk.bf16.mxu1 %vm2103_vm14, %v3445_v33  ;;  %v3780_v27 = vrot.slane %v2934_v16, 9  ;;  %v3167_v49 = vmul.f32 %v5323_v63, %v3054_v29  ;;  %v2951_v37 = vcombine.high %v2949_v17, %v2949_v17  ;;  %v3063_v57 = vrot.slane %v2942_v54, 7 }
 0x498   : > { %v3057_v14 = vsel %vm5311_vm8, %v3055_v32, %v3056_v21  ;;  %v3058_v50 = vrot.slane %v3056_v21, 2  ;;  %v3066_v51 = vrot.slane %v2950_v42, 7  ;;  %v3069_v15 = vrot.slane %v2949_v17, 7  ;;  %3886 = vmatmul.mubr.msk.bf16.vlgmr.msra.gmra.mrb[8].mxu1 %vm2103_vm14, %v3446_v60 }
 0x499   : > { %v3168_v47 = vmul.f32 %v5316_v18, %v3057_v14  ;;  %v3226_v23 = vadd.f32 %v5327_v13, %v3167_v49  ;;  %v3064_v62 = vsel %vm5311_vm8, %v3780_v27, %v3063_v57  ;;  %v3065_v48 = vrot.slane %v3063_v57, 2 }
 0x49a   : > { %v3060_v40 = vsel %vm5311_vm8, %v3058_v50, %v3059_v36  ;;  %v3068_v56 = vrot.slane %v3066_v51, 2  ;;  %v3071_v28 = vrot.slane %v3069_v15, 2  ;;  %v3072_v43 = vrot.slane %v2951_v37, 7 }
 0x49b   : > { %v3169_v53 = vmul.f32 %v5335_v10, %v3060_v40  ;;  %v3227_v25 = vadd.f32 %v5319_v30, %v3168_v47  ;;  %v3258_v54 = vmax.f32 %v3226_v23, 0.0  ;;  %v3067_v60 = vsel %vm5311_vm8, %v3065_v48, %v3066_v51 }
 0x49c   : > { %v3070_v11 = vsel %vm5311_vm8, %v3068_v56, %v3069_v15  ;;  %v3073_v39 = vsel %vm5311_vm8, %v3071_v28, %v3072_v43  ;;  %v3170_v12 = vmul.f32 %v5305_v44, %v3064_v62  ;;  %v3171_v17 = vmul.f32 %v5323_v63, %v3067_v60 }
 0x49d   : > { %v3228_v33 = vadd.f32 %v5339_v20, %v3169_v53  ;;  %v3259_v16 = vmax.f32 %v3227_v25, 0.0  ;;  %v3172_v36 = vmul.f32 %v5316_v18, %v3070_v11  ;;  %v3173_v42 = vmul.f32 %v5335_v10, %v3073_v39 }
 0x49e   : > { %v3229_v29 = vadd.f32 %v5308_v45, %v3170_v12  ;;  %v3230_v32 = vadd.f32 %v5327_v13, %v3171_v17  ;;  %v3369_v38 = vcombine.low %v3253_v8, %v3254_v46  ;;  %v3370_v44 = vcombine.low %v3255_v55, %v3256_v26 }
 0x49f   : > { %v3260_v63 = vmax.f32 %v3228_v33, 0.0  ;;  %v3231_v21 = vadd.f32 %v5319_v30, %v3172_v36  ;;  %v3232_v18 = vadd.f32 %v5339_v20, %v3173_v42  ;;  %v3386_v45 = vcombine.low %v3257_v24, %v3258_v54 }
 0x4a0   : > { %v3261_v10 = vmax.f32 %v3229_v29, 0.0  ;;  %v3262_v13 = vmax.f32 %v3230_v32, 0.0  ;;  %v3377_v61 = vrot.slane %v3369_v38, %v5295_v35  ;;  %v3384_v59 = vrot.slane %v3370_v44, %v5295_v35 }
 0x4a1   : > { %v3263_v8 = vmax.f32 %v3231_v21, 0.0  ;;  %v3264_v46 = vmax.f32 %v3232_v18, 0.0  ;;  %v3387_v58 = vcombine.low %v3259_v16, %v3260_v63  ;;  %v3420_v30 = vcombine.low %v3265_v9, %v3266_v19  ;;  %v3788_v9 = vld [vmem:[%s5659_s9] ss:$0 sm:$0xff] }
 0x4a2   : > { %v3385_v27 = vcombine.low %v3377_v61, %v3384_v59  ;;  %v3403_v52 = vcombine.low %v3261_v10, %v3262_v13  ;;  %v3435_v20 = vrot.slane %v3421_v31, %v5295_v35  ;;  %v3394_v34 = vrot.slane %v3386_v45, %v5295_v35  ;;  %v3789_v31 = vld [vmem:[%s5660_s10] ss:$0 sm:$0xff] }
 0x4a3   : > { %v3401_v55 = vrot.slane %v3387_v58, %v5295_v35  ;;  %v3404_v26 = vcombine.low %v3263_v8, %v3264_v46  ;;  %v3428_v24 = vrot.slane %v3420_v30, %v5295_v35 }
 0x4a4   : > { %v3411_v37 = vrot.slane %v3403_v52, %v5295_v35 }
 0x4a5   : > { %v3402_v49 = vcombine.low %v3394_v34, %v3401_v55  ;;  %v3418_v57 = vrot.slane %v3404_v26, %v5295_v35  ;;  %v3436_v14 = vcombine.low %v3428_v24, %v3435_v20 }
 0x4a7   : > { %v3447_v50 = vpack.c.bf16 %v3402_v49, %v3385_v27  ;;  %v3419_v22 = vcombine.low %v3411_v37, %v3418_v57 }
 0x4a9   : > { %3889 = vmatprep.mubr.msk.bf16.mxu1 %vm2103_vm14, %v3447_v50  ;;  %v3448_v41 = vpack.c.bf16 %v3436_v14, %v3419_v22 }
 0x4ab   : > { %3890 = vmatmul.mubr.msk.bf16.gmra.mrb[12].mxu1 %vm2103_vm14, %v3448_v41  ;;  %vm3577_vm14 = vcmask 130048  }
 0x56b   : > { %v3887_v19 = vpop.f32.mrb[8].mxu1 }
 0x56c   : > { %v3540_v51 = vmul.f32 %v3887_v19, %v3788_v9  ;;  %v3500_v15 = vpop.f32.mrb[9].mxu1 }
 0x56d   : > { %v3538_v35 = vmul.f32 %v3788_v9, %v3500_v15  ;;  %v3888_v47 = vpop.f32.mrb[10].mxu1 }
 0x56e   : > { %v3555_v23 = vadd.f32 %v3789_v31, %v3540_v51  ;;  %v3541_v62 = vmul.f32 %v3888_v47, %v3788_v9  ;;  %v3503_v48 = vpop.f32.mrb[11].mxu1 }
 0x56f   : > { %v3553_v40 = vadd.f32 %v3789_v31, %v3538_v35  ;;  %v3539_v56 = vmul.f32 %v3788_v9, %v3503_v48 }
 0x570   : > { %v3563_v28 = vadd.f32 %v3555_v23, %v4235_v2  ;;  %v3556_v43 = vadd.f32 %v3789_v31, %v3541_v62 }
 0x571   : > { %v3561_v53 = vadd.f32 %v3553_v40, %v4231_v0  ;;  %v3554_v25 = vadd.f32 %v3789_v31, %v3539_v56 }
 0x572   : > { %v3571_v54 = vmax.f32 %v3563_v28, 0.0  ;;  %v3564_v60 = vadd.f32 %v3556_v43, %v4237_v3 }
 0x573   : > { %v3569_v11 = vmax.f32 %v3561_v53, 0.0  ;;  %v3562_v39 = vadd.f32 %v3554_v25, %v4233_v1 }
 0x574   : > { %3580 = vst.msk [vmem:[%s4228_s16 + $0x10] sm:$0xff] %vm3577_vm14, %v3571_v54  ;;  %v3572_v12 = vmax.f32 %v3564_v60, 0.0 }
 0x575   : > { %3578 = vst.msk [vmem:[%s4228_s16] sm:$0xff] %vm3577_vm14, %v3569_v11  ;;  %v3570_v17 = vmax.f32 %v3562_v39, 0.0 }
 0x576   : > { %3581 = vst.msk [vmem:[%s4228_s16 + $0x18] sm:$0xff] %vm3577_vm14, %v3572_v12 }
 0x577   : > { %3579 = vst.msk [vmem:[%s4228_s16 + $0x8] sm:$0xff] %vm3577_vm14, %v3570_v17 }
 0x57e   : > { %v3891_v2 = vpop.f32.mrb[12].mxu1 }
 0x57f   : > { %v3544_v33 = vmul.f32 %v3891_v2, %v3788_v9  ;;  %v3516_v0 = vpop.f32.mrb[13].mxu1 }
 0x580   : > { %v3542_v16 = vmul.f32 %v3788_v9, %v3516_v0  ;;  %v3892_v36 = vpop.f32.mrb[14].mxu1 }
 0x581   : > { %v3559_v3 = vadd.f32 %v3789_v31, %v3544_v33  ;;  %v3545_v42 = vmul.f32 %v3892_v36, %v3788_v9  ;;  %v3519_v1 = vpop.f32.mrb[15].mxu1 }
 0x582   : > { %v3557_v29 = vadd.f32 %v3789_v31, %v3542_v16  ;;  %v3543_v32 = vmul.f32 %v3788_v9, %v3519_v1 }
 0x583   : > { %v3567_v38 = vadd.f32 %v3559_v3, %v4243_v6  ;;  %v3560_v44 = vadd.f32 %v3789_v31, %v3545_v42 }
 0x584   : > { %v3565_v63 = vadd.f32 %v3557_v29, %v4239_v4  ;;  %v3558_v21 = vadd.f32 %v3789_v31, %v3543_v32 }
 0x585   : > { %v3575_v18 = vmax.f32 %v3567_v38, 0.0  ;;  %v3568_v45 = vadd.f32 %v3560_v44, %v4245_v7 }
 0x586   : > { %v3573_v10 = vmax.f32 %v3565_v63, 0.0  ;;  %v3566_v13 = vadd.f32 %v3558_v21, %v4241_v5 }
 0x587   : > { %3584 = vst.msk [vmem:[%s4228_s16 + $0x30] sm:$0xff] %vm3577_vm14, %v3575_v18  ;;  %v3576_v61 = vmax.f32 %v3568_v45, 0.0 }
 0x588   : > { %3582 = vst.msk [vmem:[%s4228_s16 + $0x20] sm:$0xff] %vm3577_vm14, %v3573_v10  ;;  %v3574_v59 = vmax.f32 %v3566_v13, 0.0 }
 0x589   : > { %3585 = vst.msk [vmem:[%s4228_s16 + $0x38] sm:$0xff] %vm3577_vm14, %v3576_v61 }
 0x58a   : > { %3583 = vst.msk [vmem:[%s4228_s16 + $0x28] sm:$0xff] %vm3577_vm14, %v3574_v59 }
 0x58b PF: > { %s21_s21 = sadd.s32 1, %s4104_s21   ;;  %s5665_s29 = sld [smem:[#allocation3_spill]] }
 0x58c   : > { %p18_p3 = scmp.ge.s32.totalorder %s21_s21, 10   ;;  %s5666_s17 = smov %s4096_s19 }
 0x58d   : > { %s5667_s18 = smov %s4100_s20  ;;  %s5668_s19 = smov %s5671_s22 }
 0x58e   :  { %20 = sbr.rel (!%p18_p3) target bundleno = 3 (0x3), region = 115 }
 0x591   : > { %s5669_s20 = smov %s5665_s29 }

</bundles_post_ra>
